<compile_context>
chip_gen: v7x
topology: tpu7x:2x2x1
jax: 0.10.0
libtpu: 0.0.40
codegen_flags: <defaults>
</compile_context>

<pallas_src>
import functools

import jax
import jax.numpy as jnp
from jax.experimental import pallas as pl
from jax.experimental.pallas import tpu as pltpu


# ---------------------------------------------------------------------------
# Hardware-aware constants
# ---------------------------------------------------------------------------
_TK_MAX = 512        # target K (reduction) tile
_TM_CAP = 512        # cap for the M tile in the tiled-BN path
_TN_CAP = 2048       # cap for the N tile of the big dfc1 layer


def _vmem_limit_bytes():
    """Scoped-VMEM limit derived from the actual chip (v7x=64MiB, v5e/v6e=128MiB)."""
    try:
        cap = pltpu.get_tpu_info().vmem_capacity_bytes
    except Exception:
        cap = 64 * 1024 * 1024                      # conservative fallback (v7x-sized)
    return min(int(cap * 0.75), 100 * 1024 * 1024)  # 48 MiB on v7x, 96 MiB on v5e/v6e


_VMEM_LIMIT = _vmem_limit_bytes()
_RESIDENT_VMEM_BUDGET = _VMEM_LIMIT // 2            # fused single-pass path budget


def _round_up(x, m):
    return -(-x // m) * m


def _k_tiling(K, tk_max=_TK_MAX):
    """Minimal-padding K tiling: (tk, nk) with tk*nk >= K.

    When nk > 1, tk must be a multiple of 128 (tk is the lane dim of the (R, tk)
    operand block); when nk == 1 the block equals the full dim, no constraint."""
    if K <= tk_max:
        return K, 1
    nk = -(-K // tk_max)
    tk = _round_up(-(-K // nk), 128)
    return tk, nk


def _pick_tile(total, unit=128, cap=512):
    """Largest multiple of `unit` that divides `total` and is <= cap."""
    n = total // unit
    best, d = 1, 1
    while d <= n and d * unit <= cap:
        if n % d == 0:
            best = d
        d += 1
    return best * unit


# ---------------------------------------------------------------------------
# Pallas kernels
# ---------------------------------------------------------------------------
def _conv_bn_relu_resident_kernel(w_ref, x_ref, gamma_ref, beta_ref, o_ref, *, eps):
    """Fused conv-as-matmul + BatchNorm(batch stats) + ReLU; whole M resident.

    w:(Cout,tk) bf16, x:(tk,M) bf16, gamma/beta:(Cout,1) f32, o:(Cout,M) f32.
    Grid axis 0 is the K reduction; o_ref doubles as the f32 accumulator.
    Conv bias is intentionally absent (cancelled exactly by the mean subtraction).
    """
    k = pl.program_id(0)

    @pl.when(k == 0)
    def _():
        o_ref[...] = jnp.zeros_like(o_ref)

    o_ref[...] += jnp.dot(w_ref[...], x_ref[...], preferred_element_type=jnp.float32)

    @pl.when(k == pl.num_programs(0) - 1)
    def _():
        y = o_ref[...]
        inv_m = 1.0 / y.shape[1]
        s = jnp.sum(y, axis=1, keepdims=True)            # one-pass stats (lane reduce)
        ss = jnp.sum(y * y, axis=1, keepdims=True)
        mean = s * inv_m
        var = jnp.maximum(ss * inv_m - mean * mean, 0.0)  # biased var (torch training BN)
        scale = gamma_ref[...] * jax.lax.rsqrt(var + eps)
        shift = beta_ref[...] - mean * scale
        o_ref[...] = jnp.maximum(y * scale + shift, 0.0)


def _matmul_acc_kernel(a_ref, b_ref, o_ref):
    """Tiled matmul, accumulating directly into the resident f32 output block."""
    @pl.when(pl.program_id(1) == 0)
    def _():
        o_ref[...] = jnp.zeros_like(o_ref)

    o_ref[...] += jnp.dot(a_ref[...], b_ref[...], preferred_element_type=jnp.float32)


def _scale_shift_relu_kernel(y_ref, scale_ref, shift_ref, o_ref):
    """BN apply sweep: o = relu(y * scale + shift), per-channel scale/shift."""
    o_ref[...] = jnp.maximum(y_ref[...] * scale_ref[...] + shift_ref[...], 0.0)


def _fc_chain_kernel(h_ref, w1_ref, b1_ref, w2_ref, b2_ref, w3_ref, b3_ref, o_ref):
    """Fused efc1 (K-streamed) -> relu -> efc2 -> relu -> dfc2 -> relu.

    h:(1,tk) bf16, w1:(tk,N1) bf16, w2:(N1,N2) bf16, w3:(N2,N1) bf16, biases f32.
    o:(1,N1) f32 is used as the efc1 accumulator, then overwritten with the
    dfc2 output at the last K step; h never leaves VMEM between layers.
    """
    k = pl.program_id(0)

    @pl.when(k == 0)
    def _():
        o_ref[...] = jnp.zeros_like(o_ref)

    o_ref[...] += jnp.dot(h_ref[...], w1_ref[...], preferred_element_type=jnp.float32)

    @pl.when(k == pl.num_programs(0) - 1)
    def _():
        h1 = jnp.maximum(o_ref[...] + b1_ref[...], 0.0)
        h2 = jnp.dot(h1.astype(jnp.bfloat16), w2_ref[...],
                     preferred_element_type=jnp.float32) + b2_ref[...]
        h2 = jnp.maximum(h2, 0.0)
        h3 = jnp.dot(h2.astype(jnp.bfloat16), w3_ref[...],
                     preferred_element_type=jnp.float32) + b3_ref[...]
        o_ref[...] = jnp.maximum(h3, 0.0)


def _linear_relu_kernel(h_ref, w_ref, b_ref, o_ref):
    """dfc1: o_tile = relu(h @ w_tile + b_tile); N axis tiled & parallel."""
    o_ref[...] = jnp.maximum(
        jnp.dot(h_ref[...], w_ref[...], preferred_element_type=jnp.float32)
        + b_ref[...], 0.0)


# ---------------------------------------------------------------------------
# Pallas call wrappers
# ---------------------------------------------------------------------------
def _conv_bn_relu_resident(w_bf, xT_bf, gamma, beta, eps, tk, nk):
    Cout = w_bf.shape[0]
    M = xT_bf.shape[1]
    return pl.pallas_call(
        functools.partial(_conv_bn_relu_resident_kernel, eps=eps),
        out_shape=jax.ShapeDtypeStruct((Cout, M), jnp.float32),
        grid_spec=pltpu.PrefetchScalarGridSpec(
            num_scalar_prefetch=0,
            grid=(nk,),
            in_specs=[
                pl.BlockSpec((Cout, tk), lambda k: (0, k)),
                pl.BlockSpec((tk, M), lambda k: (k, 0)),
                pl.BlockSpec((Cout, 1), lambda k: (0, 0)),
                pl.BlockSpec((Cout, 1), lambda k: (0, 0)),
            ],
            out_specs=pl.BlockSpec((Cout, M), lambda k: (0, 0)),
        ),
        compiler_params=pltpu.CompilerParams(
            dimension_semantics=("arbitrary",),
            vmem_limit_bytes=_VMEM_LIMIT,
        ),
    )(w_bf, xT_bf, gamma, beta)


def _conv_bn_relu_tiled(w_bf, xT_bf, gamma, beta, eps, tk, nk, M):
    """Large-M path: M-tiled matmul (parallel M axis) + stats + apply sweep."""
    Cout = w_bf.shape[0]
    Mp = _round_up(M, 128)
    if Mp != M:
        xT_bf = jnp.pad(xT_bf, ((0, 0), (0, Mp - M)))
    TM = _pick_tile(Mp, 128, _TM_CAP)
    nm = Mp // TM

    y = pl.pallas_call(
        _matmul_acc_kernel,
        out_shape=jax.ShapeDtypeStruct((Cout, Mp), jnp.float32),
        grid_spec=pltpu.PrefetchScalarGridSpec(
            num_scalar_prefetch=0,
            grid=(nm, nk),
            in_specs=[
                pl.BlockSpec((Cout, tk), lambda m, k: (0, k)),
                pl.BlockSpec((tk, TM), lambda m, k: (k, m)),
            ],
            out_specs=pl.BlockSpec((Cout, TM), lambda m, k: (0, m)),
        ),
        compiler_params=pltpu.CompilerParams(
            dimension_semantics=("parallel", "arbitrary"),
            vmem_limit_bytes=_VMEM_LIMIT,
        ),
    )(w_bf, xT_bf)

    # Global per-channel batch stats over the TRUE M columns (padding excluded).
    yv = y[:, :M]
    mean = jnp.mean(yv, axis=1, keepdims=True)
    var = jnp.maximum(jnp.mean(yv * yv, axis=1, keepdims=True) - mean * mean, 0.0)
    scale = gamma * jax.lax.rsqrt(var + eps)
    shift = beta - mean * scale

    out = pl.pallas_call(
        _scale_shift_relu_kernel,
        out_shape=jax.ShapeDtypeStruct((Cout, Mp), jnp.float32),
        grid_spec=pltpu.PrefetchScalarGridSpec(
            num_scalar_prefetch=0,
            grid=(nm,),
            in_specs=[
                pl.BlockSpec((Cout, TM), lambda m: (0, m)),
                pl.BlockSpec((Cout, 1), lambda m: (0, 0)),
                pl.BlockSpec((Cout, 1), lambda m: (0, 0)),
            ],
            out_specs=pl.BlockSpec((Cout, TM), lambda m: (0, m)),
        ),
        compiler_params=pltpu.CompilerParams(
            dimension_semantics=("parallel",),
            vmem_limit_bytes=_VMEM_LIMIT,
        ),
    )(y, scale, shift)
    return out[:, :M]


def conv_bn_relu_matmul(w, xT, gamma, beta, eps=1e-5, *, use_pallas=True,
                        force_tiled=False):
    """w:(Cout,K) f32, xT:(K,M) patches -> BN+ReLU output (Cout, M) f32."""
    Cout, K = w.shape
    M = xT.shape[1]
    w_bf = w.astype(jnp.bfloat16)
    xT_bf = xT.astype(jnp.bfloat16)
    g = gamma.reshape(Cout, 1).astype(jnp.float32)
    b = beta.reshape(Cout, 1).astype(jnp.float32)

    if not use_pallas:                       # pure-JAX reference (same dtype policy)
        y = jnp.dot(w_bf, xT_bf, preferred_element_type=jnp.float32)
        mean = jnp.mean(y, axis=1, keepdims=True)
        var = jnp.var(y, axis=1, keepdims=True)
        return jnp.maximum((y - mean) * jax.lax.rsqrt(var + eps) * g + b, 0.0)

    tk, nk = _k_tiling(K)
    Kp = tk * nk
    if Kp != K:                              # zero padding does not perturb the matmul
        w_bf = jnp.pad(w_bf, ((0, 0), (0, Kp - K)))
        xT_bf = jnp.pad(xT_bf, ((0, Kp - K), (0, 0)))

    # VMEM estimate for the fused resident path: double-buffered bf16 inputs +
    # the resident f32 output block.
    resident_bytes = 2 * (Cout * tk + tk * M) * 2 + Cout * M * 4
    if resident_bytes <= _RESIDENT_VMEM_BUDGET and not force_tiled:
        return _conv_bn_relu_resident(w_bf, xT_bf, g, b, eps, tk, nk)
    return _conv_bn_relu_tiled(w_bf, xT_bf, g, b, eps, tk, nk, M)


def fc_bottleneck(h, w1T, b1, w2T, b2, w3T, b3, *, use_pallas=True):
    """Fused efc1 -> efc2 -> dfc2 (all + ReLU).  h:(1, d_big) -> (1, 2*bnd)."""
    h_bf = h.astype(jnp.bfloat16)
    w1_bf = w1T.astype(jnp.bfloat16)
    w2_bf = w2T.astype(jnp.bfloat16)
    w3_bf = w3T.astype(jnp.bfloat16)
    b1r = b1.reshape(1, -1).astype(jnp.float32)
    b2r = b2.reshape(1, -1).astype(jnp.float32)
    b3r = b3.reshape(1, -1).astype(jnp.float32)

    if not use_pallas:
        h1 = jnp.maximum(jnp.dot(h_bf, w1_bf, preferred_element_type=jnp.float32) + b1r, 0.0)
        h2 = jnp.maximum(jnp.dot(h1.astype(jnp.bfloat16), w2_bf,
                                 preferred_element_type=jnp.float32) + b2r, 0.0)
        return jnp.maximum(jnp.dot(h2.astype(jnp.bfloat16), w3_bf,
                                   preferred_element_type=jnp.float32) + b3r, 0.0)

    K = h_bf.shape[1]
    N1 = w1T.shape[1]
    N2 = w2T.shape[1]
    tk, nk = _k_tiling(K)
    Kp = tk * nk
    if Kp != K:
        h_bf = jnp.pad(h_bf, ((0, 0), (0, Kp - K)))
        w1_bf = jnp.pad(w1_bf, ((0, Kp - K), (0, 0)))

    return pl.pallas_call(
        _fc_chain_kernel,
        out_shape=jax.ShapeDtypeStruct((1, N1), jnp.float32),
        grid_spec=pltpu.PrefetchScalarGridSpec(
            num_scalar_prefetch=0,
            grid=(nk,),
            in_specs=[
                pl.BlockSpec((1, tk), lambda k: (0, k)),
                pl.BlockSpec((tk, N1), lambda k: (k, 0)),
                pl.BlockSpec((1, N1), lambda k: (0, 0)),
                pl.BlockSpec((N1, N2), lambda k: (0, 0)),
                pl.BlockSpec((1, N2), lambda k: (0, 0)),
                pl.BlockSpec((N2, N1), lambda k: (0, 0)),
                pl.BlockSpec((1, N1), lambda k: (0, 0)),
            ],
            out_specs=pl.BlockSpec((1, N1), lambda k: (0, 0)),
        ),
        compiler_params=pltpu.CompilerParams(
            dimension_semantics=("arbitrary",),
            vmem_limit_bytes=_VMEM_LIMIT,
        ),
    )(h_bf, w1_bf, b1r, w2_bf, b2r, w3_bf, b3r)


def linear_relu_out_tiled(h, wT, b, *, use_pallas=True):
    """dfc1: h:(1, 2*bnd) @ wT:(2*bnd, d_big) + b, ReLU; N tiled, lane-dense stores."""
    h_bf = h.astype(jnp.bfloat16)
    w_bf = wT.astype(jnp.bfloat16)
    br = b.reshape(1, -1).astype(jnp.float32)

    if not use_pallas:
        return jnp.maximum(jnp.dot(h_bf, w_bf, preferred_element_type=jnp.float32) + br, 0.0)

    K = h_bf.shape[1]
    N = wT.shape[1]
    Np = _round_up(N, 128)
    if Np != N:
        w_bf = jnp.pad(w_bf, ((0, 0), (0, Np - N)))
        br = jnp.pad(br, ((0, 0), (0, Np - N)))
    TN = _pick_tile(Np, 128, _TN_CAP)
    nn = Np // TN
    # TODO(synk): also stream K tiles if bottle_neck_dim ever becomes large.
    out = pl.pallas_call(
        _linear_relu_kernel,
        out_shape=jax.ShapeDtypeStruct((1, Np), jnp.float32),
        grid_spec=pltpu.PrefetchScalarGridSpec(
            num_scalar_prefetch=0,
            grid=(nn,),
            in_specs=[
                pl.BlockSpec((1, K), lambda n: (0, 0)),
                pl.BlockSpec((K, TN), lambda n: (0, n)),
                pl.BlockSpec((1, TN), lambda n: (0, n)),
            ],
            out_specs=pl.BlockSpec((1, TN), lambda n: (0, n)),
        ),
        compiler_params=pltpu.CompilerParams(
            dimension_semantics=("parallel",),
            vmem_limit_bytes=_VMEM_LIMIT,
        ),
    )(h_bf, w_bf, br)
    return out[:, :N]


# ---------------------------------------------------------------------------
# Conv / ConvTranspose built on the fused kernel (im2col glue, CNHW layout)
# ---------------------------------------------------------------------------
def _im2col_cnhw(x, kh, kw, stride, pad):
    """x:(C,N,H,W) -> patches^T (C*kh*kw, N*Ho*Wo); row order (c,i,j) matches
    torch's w.reshape(Cout, Cin*kh*kw) flattening.  Done in bf16 to halve HBM."""
    # TODO(synk): move im2col into the kernel (stream (Cin,i,j) taps from ANY-space).
    C, N, H, W = x.shape
    xp = jnp.pad(x, ((0, 0), (0, 0), (pad, pad), (pad, pad)))
    Ho = (H + 2 * pad - kh) // stride + 1
    Wo = (W + 2 * pad - kw) // stride + 1
    cols = []
    for i in range(kh):
        for j in range(kw):
            cols.append(xp[:, :, i:i + stride * Ho:stride, j:j + stride * Wo:stride])
    patches = jnp.stack(cols, axis=1)                  # (C, kh*kw, N, Ho, Wo)
    return patches.reshape(C * kh * kw, N * Ho * Wo), Ho, Wo


def conv2d_bn_relu(x, w, gamma, beta, stride, pad, eps=1e-5, use_pallas=True):
    """x:(Cin,N,H,W); w:(Cout,Cin,kh,kw) torch Conv2d layout; returns CNHW f32.
    Conv bias omitted: it is exactly cancelled by the batch-stats mean subtraction."""
    Cout, Cin, kh, kw = w.shape
    N = x.shape[1]
    xT, Ho, Wo = _im2col_cnhw(x.astype(jnp.bfloat16), kh, kw, stride, pad)
    out = conv_bn_relu_matmul(w.reshape(Cout, Cin * kh * kw), xT, gamma, beta,
                              eps, use_pallas=use_pallas)
    return out.reshape(Cout, N, Ho, Wo)


def conv_transpose2d_bn_relu(x, w, gamma, beta, stride, pad, out_pad,
                             eps=1e-5, use_pallas=True):
    """x:(Cin,N,H,W); w:(Cin,Cout,kh,kw) torch ConvTranspose2d layout."""
    # TODO(synk): sub-pixel decomposition to skip the 75% inserted-zero taps.
    _, _, kh, kw = w.shape
    C, N, H, W = x.shape
    x = x.astype(jnp.bfloat16)
    xd = jnp.zeros((C, N, (H - 1) * stride + 1, (W - 1) * stride + 1), x.dtype)
    xd = xd.at[:, :, ::stride, ::stride].set(x)
    xp = jnp.pad(xd, ((0, 0), (0, 0),
                      (kh - 1 - pad, kh - 1 - pad + out_pad),
                      (kw - 1 - pad, kw - 1 - pad + out_pad)))
    wf = jnp.transpose(w[:, :, ::-1, ::-1], (1, 0, 2, 3))   # -> (Cout, Cin, kh, kw)
    return conv2d_bn_relu(xp, wf, gamma, beta, stride=1, pad=0, eps=eps,
                          use_pallas=use_pallas)


# ---------------------------------------------------------------------------
# Full forward pass (AE_batch_norm.forward semantics, training-mode BN)
# ---------------------------------------------------------------------------
def ae_batch_norm_forward(x_nchw, p, use_pallas=True):
    # single layout conversion at the model boundary: NCHW -> CNHW
    x = jnp.transpose(x_nchw, (1, 0, 2, 3))

    x = conv2d_bn_relu(x, p["ec1_w"], p["bn16_g"], p["bn16_b"], 2, 1, use_pallas=use_pallas)
    x = conv2d_bn_relu(x, p["ec2_w"], p["bn32_g"], p["bn32_b"], 2, 2, use_pallas=use_pallas)
    x = conv2d_bn_relu(x, p["ec3_w"], p["bn64_g"], p["bn64_b"], 2, 1, use_pallas=use_pallas)

    C4, N, H8, W8 = x.shape
    # Whole tensor (batch included) flattened -- efc1_wT rows / dfc1_wT columns are
    # stored in CNHW flatten order (see init_params), so no transpose is needed here.
    h = x.reshape(1, -1)
    h = fc_bottleneck(h, p["efc1_wT"], p["efc1_b"], p["efc2_wT"], p["efc2_b"],
                      p["dfc2_wT"], p["dfc2_b"], use_pallas=use_pallas)
    h = linear_relu_out_tiled(h, p["dfc1_wT"], p["dfc1_b"], use_pallas=use_pallas)
    x = h.reshape(C4, N, H8, W8)

    x = conv_transpose2d_bn_relu(x, p["dt3_w"], p["bn32_g"], p["bn32_b"], 2, 1, 1,
                                 use_pallas=use_pallas)
    x = conv_transpose2d_bn_relu(x, p["dt2_w"], p["bn16_g"], p["bn16_b"], 2, 2, 1,
                                 use_pallas=use_pallas)
    x = conv_transpose2d_bn_relu(x, p["dt1_w"], p["bn3_g"], p["bn3_b"], 2, 1, 1,
                                 use_pallas=use_pallas)

    # CNHW -> NCHW at the model boundary
    return jnp.transpose(x, (1, 0, 2, 3))


def init_params(key, height, width, num_channels, F, bottle_neck_dim, batch_size):
    d_big = 4 * F * (width // 8) * (height // 8) * batch_size
    keys = iter(jax.random.split(key, 32))

    def w(shape, scale=0.1):
        return scale * jax.random.normal(next(keys), shape, jnp.float32)

    # Conventions (all init-time, no runtime cost):
    #  * conv/tconv biases are omitted: adding a per-channel constant right before
    #    batch-stats BatchNorm is exactly cancelled by the mean subtraction.
    #  * FC weights are stored pre-transposed (in, out); efc1_wT rows and dfc1_wT
    #    columns follow the CNHW flattening order of the conv activations.
    return {
        # encoder convs (Cout, Cin, kh, kw)  [torch Conv2d layout]
        "ec1_w": w((F, num_channels, 3, 3)),
        "ec2_w": w((2 * F, F, 5, 5)),
        "ec3_w": w((4 * F, 2 * F, 3, 3)),
        # fully connected
        "efc1_wT": w((d_big, 2 * bottle_neck_dim)), "efc1_b": w((2 * bottle_neck_dim,)),
        "efc2_wT": w((2 * bottle_neck_dim, bottle_neck_dim)), "efc2_b": w((bottle_neck_dim,)),
        "dfc2_wT": w((bottle_neck_dim, 2 * bottle_neck_dim)), "dfc2_b": w((2 * bottle_neck_dim,)),
        "dfc1_wT": w((2 * bottle_neck_dim, d_big)), "dfc1_b": w((d_big,)),
        # decoder transposed convs (Cin, Cout, kh, kw)  [torch ConvTranspose2d layout]
        "dt3_w": w((4 * F, 2 * F, 3, 3)),
        "dt2_w": w((2 * F, F, 5, 5)),
        "dt1_w": w((F, num_channels, 3, 3)),
        # batch-norm affine params (modules shared between encoder/decoder paths)
        "bn3_g": 1.0 + w((num_channels,)), "bn3_b": w((num_channels,)),
        "bn16_g": 1.0 + w((F,)),           "bn16_b": w((F,)),
        "bn32_g": 1.0 + w((2 * F,)),       "bn32_b": w((2 * F,)),
        "bn64_g": 1.0 + w((4 * F,)),       "bn64_b": w((4 * F,)),
    }


if __name__ == "__main__":
    # The module requires input batch == batch_size used to size the FC layers.
    batch_size = 2
    height = width = 16
    num_channels = 3
    filters_first_conv = 4
    bottle_neck_dim = 8

    key = jax.random.PRNGKey(0)
    kx, kp, kt = jax.random.split(key, 3)
    x = jax.random.normal(kx, (batch_size, num_channels, height, width), jnp.float32)
    params = init_params(kp, height, width, num_channels, filters_first_conv,
                         bottle_neck_dim, batch_size)

    fwd = jax.jit(ae_batch_norm_forward, static_argnames=("use_pallas",))
    out = jax.block_until_ready(fwd(x, params, use_pallas=True))
    assert out.shape == (batch_size, num_channels, height, width)
    assert bool(jnp.all(jnp.isfinite(out)))

    # Correctness: Pallas forward vs. pure-JAX reference (same bf16 dtype policy).
    ref = jax.block_until_ready(fwd(x, params, use_pallas=False))
    err = float(jnp.max(jnp.abs(out - ref)))
    assert err < 5e-2, f"pallas vs reference mismatch: max abs err = {err}"

    # Exercise the large-M tiled-BN path (not reached at the tiny model shapes):
    # K=600 -> 2 K-tiles of 384, M=1000 -> padded to 1024, 2 parallel M-tiles.
    kw_, kx_ = jax.random.split(kt)
    wt = 0.1 * jax.random.normal(kw_, (16, 600), jnp.float32)
    xt = jax.random.normal(kx_, (600, 1000), jnp.float32)
    gt = jnp.ones((16,), jnp.float32)
    bt = jnp.zeros((16,), jnp.float32)
    tiled_fn = jax.jit(functools.partial(conv_bn_relu_matmul, use_pallas=True,
                                         force_tiled=True))
    ref_fn = jax.jit(functools.partial(conv_bn_relu_matmul, use_pallas=False))
    y_tiled = jax.block_until_ready(tiled_fn(wt, xt, gt, bt))
    y_ref = jax.block_until_ready(ref_fn(wt, xt, gt, bt))
    errt = float(jnp.max(jnp.abs(y_tiled - y_ref)))
    assert errt < 5e-2, f"tiled BN path mismatch: max abs err = {errt}"

    print("KERNEL_OK")
</pallas_src>

<mosaic_0001>
module attributes {stable_mosaic.version = 11 : i64} {
  func.func @_conv_bn_relu_resident_kernel(%arg0: i32, %arg1: memref<4x27xbf16, #tpu.memory_space<vmem>>, %arg2: memref<27x128xbf16, #tpu.memory_space<vmem>>, %arg3: memref<4x1xf32, #tpu.memory_space<vmem>>, %arg4: memref<4x1xf32, #tpu.memory_space<vmem>>, %arg5: memref<4x128xf32, #tpu.memory_space<vmem>>) attributes {dimension_semantics = [#tpu.dimension_semantics<arbitrary>], iteration_bounds = array<i64: 1>, scalar_prefetch = 0 : i64, scratch_operands = 0 : i64, tpu.core_type = #tpu.core_type<tc>, window_params = [{transform_indices = @transform_0, window_bounds = array<i64: 4, 27>}, {transform_indices = @transform_1, window_bounds = array<i64: 27, 128>}, {pipeline_mode = #tpu.pipeline_mode<synchronous>, transform_indices = @transform_2, window_bounds = array<i64: 4, 1>}, {pipeline_mode = #tpu.pipeline_mode<synchronous>, transform_indices = @transform_3, window_bounds = array<i64: 4, 1>}, {pipeline_mode = #tpu.pipeline_mode<synchronous>, transform_indices = @transform_4, window_bounds = array<i64: 4, 128>}]} {
    %c0_i32 = arith.constant 0 : i32
    %0 = arith.cmpi eq, %arg0, %c0_i32 : i32
    %1 = arith.extui %0 : i1 to i32
    %c0_i32_0 = arith.constant 0 : i32
    %2 = arith.cmpi ne, %1, %c0_i32_0 : i32
    scf.if %2 {
      %cst_10 = arith.constant 0.000000e+00 : f32
      %12 = vector.broadcast %cst_10 : f32 to vector<4x128xf32>
      %c0_11 = arith.constant 0 : index
      %c0_12 = arith.constant 0 : index
      %13 = vector.load %arg5[%c0_11, %c0_12] : memref<4x128xf32, #tpu.memory_space<vmem>>, vector<4x128xf32>
      tpu.vector_store %arg5[%c0_11, %c0_12], %12 {strides = array<i32>} : memref<4x128xf32, #tpu.memory_space<vmem>>, vector<4x128xf32>,
    } else {
    }
    %c0 = arith.constant 0 : index
    %c0_1 = arith.constant 0 : index
    %3 = vector.load %arg5[%c0, %c0_1] : memref<4x128xf32, #tpu.memory_space<vmem>>, vector<4x128xf32>
    %c0_2 = arith.constant 0 : index
    %c0_3 = arith.constant 0 : index
    %4 = vector.load %arg1[%c0_2, %c0_3] : memref<4x27xbf16, #tpu.memory_space<vmem>>, vector<4x27xbf16>
    %c0_4 = arith.constant 0 : index
    %c0_5 = arith.constant 0 : index
    %5 = vector.load %arg2[%c0_4, %c0_5] : memref<27x128xbf16, #tpu.memory_space<vmem>>, vector<27x128xbf16>
    %cst = arith.constant dense<0.000000e+00> : vector<4x128xf32>
    %6 = tpu.matmul %4, %5, %cst {dimension_numbers = #tpu.dot_dimension_numbers<[1], [0], [0], [1], [0, 0, 1, 1], [], []>} : vector<4x27xbf16>, vector<27x128xbf16>, vector<4x128xf32> -> vector<4x128xf32>
    %7 = arith.addf %3, %6 : vector<4x128xf32>
    %c0_6 = arith.constant 0 : index
    %c0_7 = arith.constant 0 : index
    %8 = vector.load %arg5[%c0_6, %c0_7] : memref<4x128xf32, #tpu.memory_space<vmem>>, vector<4x128xf32>
    tpu.vector_store %arg5[%c0_6, %c0_7], %7 {strides = array<i32>} : memref<4x128xf32, #tpu.memory_space<vmem>>, vector<4x128xf32>,
    %c0_i32_8 = arith.constant 0 : i32
    %9 = arith.cmpi eq, %arg0, %c0_i32_8 : i32
    %10 = arith.extui %9 : i1 to i32
    %c0_i32_9 = arith.constant 0 : i32
    %11 = arith.cmpi ne, %10, %c0_i32_9 : i32
    scf.if %11 {
      %c0_10 = arith.constant 0 : index
      %c0_11 = arith.constant 0 : index
      %12 = vector.load %arg5[%c0_10, %c0_11] : memref<4x128xf32, #tpu.memory_space<vmem>>, vector<4x128xf32>
      %cst_12 = arith.constant dense<0.000000e+00> : vector<4xf32>
      %13 = vector.multi_reduction <add>, %12, %cst_12 [1] : vector<4x128xf32> to vector<4xf32>
      %14 = vector.shape_cast %13 : vector<4xf32> to vector<4x1xf32>
      %15 = arith.mulf %12, %12 : vector<4x128xf32>
      %cst_13 = arith.constant dense<0.000000e+00> : vector<4xf32>
      %16 = vector.multi_reduction <add>, %15, %cst_13 [1] : vector<4x128xf32> to vector<4xf32>
      %17 = vector.shape_cast %16 : vector<4xf32> to vector<4x1xf32>
      %cst_14 = arith.constant 7.812500e-03 : f32
      %18 = vector.broadcast %cst_14 : f32 to vector<4x1xf32>
      %19 = arith.mulf %14, %18 : vector<4x1xf32>
      %cst_15 = arith.constant 7.812500e-03 : f32
      %20 = vector.broadcast %cst_15 : f32 to vector<4x1xf32>
      %21 = arith.mulf %17, %20 : vector<4x1xf32>
      %22 = arith.mulf %19, %19 : vector<4x1xf32>
      %23 = arith.subf %21, %22 : vector<4x1xf32>
      %cst_16 = arith.constant 0.000000e+00 : f32
      %24 = vector.broadcast %cst_16 : f32 to vector<4x1xf32>
      %25 = arith.maximumf %23, %24 : vector<4x1xf32>
      %c0_17 = arith.constant 0 : index
      %c0_18 = arith.constant 0 : index
      %26 = vector.load %arg3[%c0_17, %c0_18] : memref<4x1xf32, #tpu.memory_space<vmem>>, vector<4x1xf32>
      %cst_19 = arith.constant 9.99999974E-6 : f32
      %27 = vector.broadcast %cst_19 : f32 to vector<4x1xf32>
      %28 = arith.addf %25, %27 : vector<4x1xf32>
      %29 = math.rsqrt %28 : vector<4x1xf32>
      %30 = arith.mulf %26, %29 : vector<4x1xf32>
      %c0_20 = arith.constant 0 : index
      %c0_21 = arith.constant 0 : index
      %31 = vector.load %arg4[%c0_20, %c0_21] : memref<4x1xf32, #tpu.memory_space<vmem>>, vector<4x1xf32>
      %32 = arith.mulf %19, %30 : vector<4x1xf32>
      %33 = arith.subf %31, %32 : vector<4x1xf32>
      %34 = vector.broadcast %30 : vector<4x1xf32> to vector<4x128xf32>
      %35 = arith.mulf %12, %34 : vector<4x128xf32>
      %36 = vector.broadcast %33 : vector<4x1xf32> to vector<4x128xf32>
      %37 = arith.addf %35, %36 : vector<4x128xf32>
      %cst_22 = arith.constant 0.000000e+00 : f32
      %38 = vector.broadcast %cst_22 : f32 to vector<4x128xf32>
      %39 = arith.maximumf %37, %38 : vector<4x128xf32>
      %c0_23 = arith.constant 0 : index
      %c0_24 = arith.constant 0 : index
      %40 = vector.load %arg5[%c0_23, %c0_24] : memref<4x128xf32, #tpu.memory_space<vmem>>, vector<4x128xf32>
      tpu.vector_store %arg5[%c0_23, %c0_24], %39 {strides = array<i32>} : memref<4x128xf32, #tpu.memory_space<vmem>>, vector<4x128xf32>,
    } else {
    }
    return
  }
  func.func @transform_0(%arg0: i32) -> (i32, i32) {
    %c0_i32 = arith.constant 0 : i32
    %c0_i32_0 = arith.constant 0 : i32
    return %c0_i32, %arg0 : i32, i32
  }
  func.func @transform_1(%arg0: i32) -> (i32, i32) {
    %c0_i32 = arith.constant 0 : i32
    %c0_i32_0 = arith.constant 0 : i32
    return %arg0, %c0_i32 : i32, i32
  }
  func.func @transform_2(%arg0: i32) -> (i32, i32) {
    %c0_i32 = arith.constant 0 : i32
    %c0_i32_0 = arith.constant 0 : i32
    %c0_i32_1 = arith.constant 0 : i32
    return %c0_i32, %c0_i32_0 : i32, i32
  }
  func.func @transform_3(%arg0: i32) -> (i32, i32) {
    %c0_i32 = arith.constant 0 : i32
    %c0_i32_0 = arith.constant 0 : i32
    %c0_i32_1 = arith.constant 0 : i32
    return %c0_i32, %c0_i32_0 : i32, i32
  }
  func.func @transform_4(%arg0: i32) -> (i32, i32) {
    %c0_i32 = arith.constant 0 : i32
    %c0_i32_0 = arith.constant 0 : i32
    %c0_i32_1 = arith.constant 0 : i32
    return %c0_i32, %c0_i32_0 : i32, i32
  }
}

module attributes {stable_mosaic.version = 11 : i64} {
  func.func @_conv_bn_relu_resident_kernel(%arg0: i32, %arg1: memref<8x100xbf16, #tpu.memory_space<vmem>>, %arg2: memref<100x32xbf16, #tpu.memory_space<vmem>>, %arg3: memref<8x1xf32, #tpu.memory_space<vmem>>, %arg4: memref<8x1xf32, #tpu.memory_space<vmem>>, %arg5: memref<8x32xf32, #tpu.memory_space<vmem>>) attributes {dimension_semantics = [#tpu.dimension_semantics<arbitrary>], iteration_bounds = array<i64: 1>, scalar_prefetch = 0 : i64, scratch_operands = 0 : i64, tpu.core_type = #tpu.core_type<tc>, window_params = [{transform_indices = @transform_0, window_bounds = array<i64: 8, 100>}, {transform_indices = @transform_1, window_bounds = array<i64: 100, 32>}, {pipeline_mode = #tpu.pipeline_mode<synchronous>, transform_indices = @transform_2, window_bounds = array<i64: 8, 1>}, {pipeline_mode = #tpu.pipeline_mode<synchronous>, transform_indices = @transform_3, window_bounds = array<i64: 8, 1>}, {pipeline_mode = #tpu.pipeline_mode<synchronous>, transform_indices = @transform_4, window_bounds = array<i64: 8, 32>}]} {
    %c0_i32 = arith.constant 0 : i32
    %0 = arith.cmpi eq, %arg0, %c0_i32 : i32
    %1 = arith.extui %0 : i1 to i32
    %c0_i32_0 = arith.constant 0 : i32
    %2 = arith.cmpi ne, %1, %c0_i32_0 : i32
    scf.if %2 {
      %cst_10 = arith.constant 0.000000e+00 : f32
      %12 = vector.broadcast %cst_10 : f32 to vector<8x32xf32>
      %c0_11 = arith.constant 0 : index
      %c0_12 = arith.constant 0 : index
      %13 = vector.load %arg5[%c0_11, %c0_12] : memref<8x32xf32, #tpu.memory_space<vmem>>, vector<8x32xf32>
      tpu.vector_store %arg5[%c0_11, %c0_12], %12 {strides = array<i32>} : memref<8x32xf32, #tpu.memory_space<vmem>>, vector<8x32xf32>,
    } else {
    }
    %c0 = arith.constant 0 : index
    %c0_1 = arith.constant 0 : index
    %3 = vector.load %arg5[%c0, %c0_1] : memref<8x32xf32, #tpu.memory_space<vmem>>, vector<8x32xf32>
    %c0_2 = arith.constant 0 : index
    %c0_3 = arith.constant 0 : index
    %4 = vector.load %arg1[%c0_2, %c0_3] : memref<8x100xbf16, #tpu.memory_space<vmem>>, vector<8x100xbf16>
    %c0_4 = arith.constant 0 : index
    %c0_5 = arith.constant 0 : index
    %5 = vector.load %arg2[%c0_4, %c0_5] : memref<100x32xbf16, #tpu.memory_space<vmem>>, vector<100x32xbf16>
    %cst = arith.constant dense<0.000000e+00> : vector<8x32xf32>
    %6 = tpu.matmul %4, %5, %cst {dimension_numbers = #tpu.dot_dimension_numbers<[1], [0], [0], [1], [0, 0, 1, 1], [], []>} : vector<8x100xbf16>, vector<100x32xbf16>, vector<8x32xf32> -> vector<8x32xf32>
    %7 = arith.addf %3, %6 : vector<8x32xf32>
    %c0_6 = arith.constant 0 : index
    %c0_7 = arith.constant 0 : index
    %8 = vector.load %arg5[%c0_6, %c0_7] : memref<8x32xf32, #tpu.memory_space<vmem>>, vector<8x32xf32>
    tpu.vector_store %arg5[%c0_6, %c0_7], %7 {strides = array<i32>} : memref<8x32xf32, #tpu.memory_space<vmem>>, vector<8x32xf32>,
    %c0_i32_8 = arith.constant 0 : i32
    %9 = arith.cmpi eq, %arg0, %c0_i32_8 : i32
    %10 = arith.extui %9 : i1 to i32
    %c0_i32_9 = arith.constant 0 : i32
    %11 = arith.cmpi ne, %10, %c0_i32_9 : i32
    scf.if %11 {
      %c0_10 = arith.constant 0 : index
      %c0_11 = arith.constant 0 : index
      %12 = vector.load %arg5[%c0_10, %c0_11] : memref<8x32xf32, #tpu.memory_space<vmem>>, vector<8x32xf32>
      %cst_12 = arith.constant dense<0.000000e+00> : vector<8xf32>
      %13 = vector.multi_reduction <add>, %12, %cst_12 [1] : vector<8x32xf32> to vector<8xf32>
      %14 = vector.shape_cast %13 : vector<8xf32> to vector<8x1xf32>
      %15 = arith.mulf %12, %12 : vector<8x32xf32>
      %cst_13 = arith.constant dense<0.000000e+00> : vector<8xf32>
      %16 = vector.multi_reduction <add>, %15, %cst_13 [1] : vector<8x32xf32> to vector<8xf32>
      %17 = vector.shape_cast %16 : vector<8xf32> to vector<8x1xf32>
      %cst_14 = arith.constant 3.125000e-02 : f32
      %18 = vector.broadcast %cst_14 : f32 to vector<8x1xf32>
      %19 = arith.mulf %14, %18 : vector<8x1xf32>
      %cst_15 = arith.constant 3.125000e-02 : f32
      %20 = vector.broadcast %cst_15 : f32 to vector<8x1xf32>
      %21 = arith.mulf %17, %20 : vector<8x1xf32>
      %22 = arith.mulf %19, %19 : vector<8x1xf32>
      %23 = arith.subf %21, %22 : vector<8x1xf32>
      %cst_16 = arith.constant 0.000000e+00 : f32
      %24 = vector.broadcast %cst_16 : f32 to vector<8x1xf32>
      %25 = arith.maximumf %23, %24 : vector<8x1xf32>
      %c0_17 = arith.constant 0 : index
      %c0_18 = arith.constant 0 : index
      %26 = vector.load %arg3[%c0_17, %c0_18] : memref<8x1xf32, #tpu.memory_space<vmem>>, vector<8x1xf32>
      %cst_19 = arith.constant 9.99999974E-6 : f32
      %27 = vector.broadcast %cst_19 : f32 to vector<8x1xf32>
      %28 = arith.addf %25, %27 : vector<8x1xf32>
      %29 = math.rsqrt %28 : vector<8x1xf32>
      %30 = arith.mulf %26, %29 : vector<8x1xf32>
      %c0_20 = arith.constant 0 : index
      %c0_21 = arith.constant 0 : index
      %31 = vector.load %arg4[%c0_20, %c0_21] : memref<8x1xf32, #tpu.memory_space<vmem>>, vector<8x1xf32>
      %32 = arith.mulf %19, %30 : vector<8x1xf32>
      %33 = arith.subf %31, %32 : vector<8x1xf32>
      %34 = vector.broadcast %30 : vector<8x1xf32> to vector<8x32xf32>
      %35 = arith.mulf %12, %34 : vector<8x32xf32>
      %36 = vector.broadcast %33 : vector<8x1xf32> to vector<8x32xf32>
      %37 = arith.addf %35, %36 : vector<8x32xf32>
      %cst_22 = arith.constant 0.000000e+00 : f32
      %38 = vector.broadcast %cst_22 : f32 to vector<8x32xf32>
      %39 = arith.maximumf %37, %38 : vector<8x32xf32>
      %c0_23 = arith.constant 0 : index
      %c0_24 = arith.constant 0 : index
      %40 = vector.load %arg5[%c0_23, %c0_24] : memref<8x32xf32, #tpu.memory_space<vmem>>, vector<8x32xf32>
      tpu.vector_store %arg5[%c0_23, %c0_24], %39 {strides = array<i32>} : memref<8x32xf32, #tpu.memory_space<vmem>>, vector<8x32xf32>,
    } else {
    }
    return
  }
  func.func @transform_0(%arg0: i32) -> (i32, i32) {
    %c0_i32 = arith.constant 0 : i32
    %c0_i32_0 = arith.constant 0 : i32
    return %c0_i32, %arg0 : i32, i32
  }
  func.func @transform_1(%arg0: i32) -> (i32, i32) {
    %c0_i32 = arith.constant 0 : i32
    %c0_i32_0 = arith.constant 0 : i32
    return %arg0, %c0_i32 : i32, i32
  }
  func.func @transform_2(%arg0: i32) -> (i32, i32) {
    %c0_i32 = arith.constant 0 : i32
    %c0_i32_0 = arith.constant 0 : i32
    %c0_i32_1 = arith.constant 0 : i32
    return %c0_i32, %c0_i32_0 : i32, i32
  }
  func.func @transform_3(%arg0: i32) -> (i32, i32) {
    %c0_i32 = arith.constant 0 : i32
    %c0_i32_0 = arith.constant 0 : i32
    %c0_i32_1 = arith.constant 0 : i32
    return %c0_i32, %c0_i32_0 : i32, i32
  }
  func.func @transform_4(%arg0: i32) -> (i32, i32) {
    %c0_i32 = arith.constant 0 : i32
    %c0_i32_0 = arith.constant 0 : i32
    %c0_i32_1 = arith.constant 0 : i32
    return %c0_i32, %c0_i32_0 : i32, i32
  }
}

module attributes {stable_mosaic.version = 11 : i64} {
  func.func @_conv_bn_relu_resident_kernel(%arg0: i32, %arg1: memref<16x72xbf16, #tpu.memory_space<vmem>>, %arg2: memref<72x8xbf16, #tpu.memory_space<vmem>>, %arg3: memref<16x1xf32, #tpu.memory_space<vmem>>, %arg4: memref<16x1xf32, #tpu.memory_space<vmem>>, %arg5: memref<16x8xf32, #tpu.memory_space<vmem>>) attributes {dimension_semantics = [#tpu.dimension_semantics<arbitrary>], iteration_bounds = array<i64: 1>, scalar_prefetch = 0 : i64, scratch_operands = 0 : i64, tpu.core_type = #tpu.core_type<tc>, window_params = [{transform_indices = @transform_0, window_bounds = array<i64: 16, 72>}, {transform_indices = @transform_1, window_bounds = array<i64: 72, 8>}, {pipeline_mode = #tpu.pipeline_mode<synchronous>, transform_indices = @transform_2, window_bounds = array<i64: 16, 1>}, {pipeline_mode = #tpu.pipeline_mode<synchronous>, transform_indices = @transform_3, window_bounds = array<i64: 16, 1>}, {pipeline_mode = #tpu.pipeline_mode<synchronous>, transform_indices = @transform_4, window_bounds = array<i64: 16, 8>}]} {
    %c0_i32 = arith.constant 0 : i32
    %0 = arith.cmpi eq, %arg0, %c0_i32 : i32
    %1 = arith.extui %0 : i1 to i32
    %c0_i32_0 = arith.constant 0 : i32
    %2 = arith.cmpi ne, %1, %c0_i32_0 : i32
    scf.if %2 {
      %cst_10 = arith.constant 0.000000e+00 : f32
      %12 = vector.broadcast %cst_10 : f32 to vector<16x8xf32>
      %c0_11 = arith.constant 0 : index
      %c0_12 = arith.constant 0 : index
      %13 = vector.load %arg5[%c0_11, %c0_12] : memref<16x8xf32, #tpu.memory_space<vmem>>, vector<16x8xf32>
      tpu.vector_store %arg5[%c0_11, %c0_12], %12 {strides = array<i32>} : memref<16x8xf32, #tpu.memory_space<vmem>>, vector<16x8xf32>,
    } else {
    }
    %c0 = arith.constant 0 : index
    %c0_1 = arith.constant 0 : index
    %3 = vector.load %arg5[%c0, %c0_1] : memref<16x8xf32, #tpu.memory_space<vmem>>, vector<16x8xf32>
    %c0_2 = arith.constant 0 : index
    %c0_3 = arith.constant 0 : index
    %4 = vector.load %arg1[%c0_2, %c0_3] : memref<16x72xbf16, #tpu.memory_space<vmem>>, vector<16x72xbf16>
    %c0_4 = arith.constant 0 : index
    %c0_5 = arith.constant 0 : index
    %5 = vector.load %arg2[%c0_4, %c0_5] : memref<72x8xbf16, #tpu.memory_space<vmem>>, vector<72x8xbf16>
    %cst = arith.constant dense<0.000000e+00> : vector<16x8xf32>
    %6 = tpu.matmul %4, %5, %cst {dimension_numbers = #tpu.dot_dimension_numbers<[1], [0], [0], [1], [0, 0, 1, 1], [], []>} : vector<16x72xbf16>, vector<72x8xbf16>, vector<16x8xf32> -> vector<16x8xf32>
    %7 = arith.addf %3, %6 : vector<16x8xf32>
    %c0_6 = arith.constant 0 : index
    %c0_7 = arith.constant 0 : index
    %8 = vector.load %arg5[%c0_6, %c0_7] : memref<16x8xf32, #tpu.memory_space<vmem>>, vector<16x8xf32>
    tpu.vector_store %arg5[%c0_6, %c0_7], %7 {strides = array<i32>} : memref<16x8xf32, #tpu.memory_space<vmem>>, vector<16x8xf32>,
    %c0_i32_8 = arith.constant 0 : i32
    %9 = arith.cmpi eq, %arg0, %c0_i32_8 : i32
    %10 = arith.extui %9 : i1 to i32
    %c0_i32_9 = arith.constant 0 : i32
    %11 = arith.cmpi ne, %10, %c0_i32_9 : i32
    scf.if %11 {
      %c0_10 = arith.constant 0 : index
      %c0_11 = arith.constant 0 : index
      %12 = vector.load %arg5[%c0_10, %c0_11] : memref<16x8xf32, #tpu.memory_space<vmem>>, vector<16x8xf32>
      %cst_12 = arith.constant dense<0.000000e+00> : vector<16xf32>
      %13 = vector.multi_reduction <add>, %12, %cst_12 [1] : vector<16x8xf32> to vector<16xf32>
      %14 = vector.shape_cast %13 : vector<16xf32> to vector<16x1xf32>
      %15 = arith.mulf %12, %12 : vector<16x8xf32>
      %cst_13 = arith.constant dense<0.000000e+00> : vector<16xf32>
      %16 = vector.multi_reduction <add>, %15, %cst_13 [1] : vector<16x8xf32> to vector<16xf32>
      %17 = vector.shape_cast %16 : vector<16xf32> to vector<16x1xf32>
      %cst_14 = arith.constant 1.250000e-01 : f32
      %18 = vector.broadcast %cst_14 : f32 to vector<16x1xf32>
      %19 = arith.mulf %14, %18 : vector<16x1xf32>
      %cst_15 = arith.constant 1.250000e-01 : f32
      %20 = vector.broadcast %cst_15 : f32 to vector<16x1xf32>
      %21 = arith.mulf %17, %20 : vector<16x1xf32>
      %22 = arith.mulf %19, %19 : vector<16x1xf32>
      %23 = arith.subf %21, %22 : vector<16x1xf32>
      %cst_16 = arith.constant 0.000000e+00 : f32
      %24 = vector.broadcast %cst_16 : f32 to vector<16x1xf32>
      %25 = arith.maximumf %23, %24 : vector<16x1xf32>
      %c0_17 = arith.constant 0 : index
      %c0_18 = arith.constant 0 : index
      %26 = vector.load %arg3[%c0_17, %c0_18] : memref<16x1xf32, #tpu.memory_space<vmem>>, vector<16x1xf32>
      %cst_19 = arith.constant 9.99999974E-6 : f32
      %27 = vector.broadcast %cst_19 : f32 to vector<16x1xf32>
      %28 = arith.addf %25, %27 : vector<16x1xf32>
      %29 = math.rsqrt %28 : vector<16x1xf32>
      %30 = arith.mulf %26, %29 : vector<16x1xf32>
      %c0_20 = arith.constant 0 : index
      %c0_21 = arith.constant 0 : index
      %31 = vector.load %arg4[%c0_20, %c0_21] : memref<16x1xf32, #tpu.memory_space<vmem>>, vector<16x1xf32>
      %32 = arith.mulf %19, %30 : vector<16x1xf32>
      %33 = arith.subf %31, %32 : vector<16x1xf32>
      %34 = vector.broadcast %30 : vector<16x1xf32> to vector<16x8xf32>
      %35 = arith.mulf %12, %34 : vector<16x8xf32>
      %36 = vector.broadcast %33 : vector<16x1xf32> to vector<16x8xf32>
      %37 = arith.addf %35, %36 : vector<16x8xf32>
      %cst_22 = arith.constant 0.000000e+00 : f32
      %38 = vector.broadcast %cst_22 : f32 to vector<16x8xf32>
      %39 = arith.maximumf %37, %38 : vector<16x8xf32>
      %c0_23 = arith.constant 0 : index
      %c0_24 = arith.constant 0 : index
      %40 = vector.load %arg5[%c0_23, %c0_24] : memref<16x8xf32, #tpu.memory_space<vmem>>, vector<16x8xf32>
      tpu.vector_store %arg5[%c0_23, %c0_24], %39 {strides = array<i32>} : memref<16x8xf32, #tpu.memory_space<vmem>>, vector<16x8xf32>,
    } else {
    }
    return
  }
  func.func @transform_0(%arg0: i32) -> (i32, i32) {
    %c0_i32 = arith.constant 0 : i32
    %c0_i32_0 = arith.constant 0 : i32
    return %c0_i32, %arg0 : i32, i32
  }
  func.func @transform_1(%arg0: i32) -> (i32, i32) {
    %c0_i32 = arith.constant 0 : i32
    %c0_i32_0 = arith.constant 0 : i32
    return %arg0, %c0_i32 : i32, i32
  }
  func.func @transform_2(%arg0: i32) -> (i32, i32) {
    %c0_i32 = arith.constant 0 : i32
    %c0_i32_0 = arith.constant 0 : i32
    %c0_i32_1 = arith.constant 0 : i32
    return %c0_i32, %c0_i32_0 : i32, i32
  }
  func.func @transform_3(%arg0: i32) -> (i32, i32) {
    %c0_i32 = arith.constant 0 : i32
    %c0_i32_0 = arith.constant 0 : i32
    %c0_i32_1 = arith.constant 0 : i32
    return %c0_i32, %c0_i32_0 : i32, i32
  }
  func.func @transform_4(%arg0: i32) -> (i32, i32) {
    %c0_i32 = arith.constant 0 : i32
    %c0_i32_0 = arith.constant 0 : i32
    %c0_i32_1 = arith.constant 0 : i32
    return %c0_i32, %c0_i32_0 : i32, i32
  }
}

module attributes {stable_mosaic.version = 11 : i64} {
  func.func @_fc_chain_kernel(%arg0: i32, %arg1: memref<1x128xbf16, #tpu.memory_space<vmem>>, %arg2: memref<128x16xbf16, #tpu.memory_space<vmem>>, %arg3: memref<1x16xf32, #tpu.memory_space<vmem>>, %arg4: memref<16x8xbf16, #tpu.memory_space<vmem>>, %arg5: memref<1x8xf32, #tpu.memory_space<vmem>>, %arg6: memref<8x16xbf16, #tpu.memory_space<vmem>>, %arg7: memref<1x16xf32, #tpu.memory_space<vmem>>, %arg8: memref<1x16xf32, #tpu.memory_space<vmem>>) attributes {dimension_semantics = [#tpu.dimension_semantics<arbitrary>], iteration_bounds = array<i64: 1>, scalar_prefetch = 0 : i64, scratch_operands = 0 : i64, tpu.core_type = #tpu.core_type<tc>, window_params = [{transform_indices = @transform_0, window_bounds = array<i64: 1, 128>}, {transform_indices = @transform_1, window_bounds = array<i64: 128, 16>}, {pipeline_mode = #tpu.pipeline_mode<synchronous>, transform_indices = @transform_2, window_bounds = array<i64: 1, 16>}, {pipeline_mode = #tpu.pipeline_mode<synchronous>, transform_indices = @transform_3, window_bounds = array<i64: 16, 8>}, {pipeline_mode = #tpu.pipeline_mode<synchronous>, transform_indices = @transform_4, window_bounds = array<i64: 1, 8>}, {pipeline_mode = #tpu.pipeline_mode<synchronous>, transform_indices = @transform_5, window_bounds = array<i64: 8, 16>}, {pipeline_mode = #tpu.pipeline_mode<synchronous>, transform_indices = @transform_6, window_bounds = array<i64: 1, 16>}, {pipeline_mode = #tpu.pipeline_mode<synchronous>, transform_indices = @transform_7, window_bounds = array<i64: 1, 16>}]} {
    %c0_i32 = arith.constant 0 : i32
    %0 = arith.cmpi eq, %arg0, %c0_i32 : i32
    %1 = arith.extui %0 : i1 to i32
    %c0_i32_0 = arith.constant 0 : i32
    %2 = arith.cmpi ne, %1, %c0_i32_0 : i32
    scf.if %2 {
      %cst_10 = arith.constant 0.000000e+00 : f32
      %12 = vector.broadcast %cst_10 : f32 to vector<1x16xf32>
      %c0_11 = arith.constant 0 : index
      %c0_12 = arith.constant 0 : index
      %13 = vector.load %arg8[%c0_11, %c0_12] : memref<1x16xf32, #tpu.memory_space<vmem>>, vector<1x16xf32>
      tpu.vector_store %arg8[%c0_11, %c0_12], %12 {strides = array<i32>} : memref<1x16xf32, #tpu.memory_space<vmem>>, vector<1x16xf32>,
    } else {
    }
    %c0 = arith.constant 0 : index
    %c0_1 = arith.constant 0 : index
    %3 = vector.load %arg8[%c0, %c0_1] : memref<1x16xf32, #tpu.memory_space<vmem>>, vector<1x16xf32>
    %c0_2 = arith.constant 0 : index
    %c0_3 = arith.constant 0 : index
    %4 = vector.load %arg1[%c0_2, %c0_3] : memref<1x128xbf16, #tpu.memory_space<vmem>>, vector<1x128xbf16>
    %c0_4 = arith.constant 0 : index
    %c0_5 = arith.constant 0 : index
    %5 = vector.load %arg2[%c0_4, %c0_5] : memref<128x16xbf16, #tpu.memory_space<vmem>>, vector<128x16xbf16>
    %cst = arith.constant dense<0.000000e+00> : vector<1x16xf32>
    %6 = tpu.matmul %4, %5, %cst {dimension_numbers = #tpu.dot_dimension_numbers<[1], [0], [0], [1], [0, 0, 1, 1], [], []>} : vector<1x128xbf16>, vector<128x16xbf16>, vector<1x16xf32> -> vector<1x16xf32>
    %7 = arith.addf %3, %6 : vector<1x16xf32>
    %c0_6 = arith.constant 0 : index
    %c0_7 = arith.constant 0 : index
    %8 = vector.load %arg8[%c0_6, %c0_7] : memref<1x16xf32, #tpu.memory_space<vmem>>, vector<1x16xf32>
    tpu.vector_store %arg8[%c0_6, %c0_7], %7 {strides = array<i32>} : memref<1x16xf32, #tpu.memory_space<vmem>>, vector<1x16xf32>,
    %c0_i32_8 = arith.constant 0 : i32
    %9 = arith.cmpi eq, %arg0, %c0_i32_8 : i32
    %10 = arith.extui %9 : i1 to i32
    %c0_i32_9 = arith.constant 0 : i32
    %11 = arith.cmpi ne, %10, %c0_i32_9 : i32
    scf.if %11 {
      %c0_10 = arith.constant 0 : index
      %c0_11 = arith.constant 0 : index
      %12 = vector.load %arg8[%c0_10, %c0_11] : memref<1x16xf32, #tpu.memory_space<vmem>>, vector<1x16xf32>
      %c0_12 = arith.constant 0 : index
      %c0_13 = arith.constant 0 : index
      %13 = vector.load %arg3[%c0_12, %c0_13] : memref<1x16xf32, #tpu.memory_space<vmem>>, vector<1x16xf32>
      %14 = arith.addf %12, %13 : vector<1x16xf32>
      %cst_14 = arith.constant 0.000000e+00 : f32
      %15 = vector.broadcast %cst_14 : f32 to vector<1x16xf32>
      %16 = arith.maximumf %14, %15 : vector<1x16xf32>
      %17 = arith.truncf %16 : vector<1x16xf32> to vector<1x16xbf16>
      %c0_15 = arith.constant 0 : index
      %c0_16 = arith.constant 0 : index
      %18 = vector.load %arg4[%c0_15, %c0_16] : memref<16x8xbf16, #tpu.memory_space<vmem>>, vector<16x8xbf16>
      %cst_17 = arith.constant dense<0.000000e+00> : vector<1x8xf32>
      %19 = tpu.matmul %17, %18, %cst_17 {dimension_numbers = #tpu.dot_dimension_numbers<[1], [0], [0], [1], [0, 0, 1, 1], [], []>} : vector<1x16xbf16>, vector<16x8xbf16>, vector<1x8xf32> -> vector<1x8xf32>
      %c0_18 = arith.constant 0 : index
      %c0_19 = arith.constant 0 : index
      %20 = vector.load %arg5[%c0_18, %c0_19] : memref<1x8xf32, #tpu.memory_space<vmem>>, vector<1x8xf32>
      %21 = arith.addf %19, %20 : vector<1x8xf32>
      %cst_20 = arith.constant 0.000000e+00 : f32
      %22 = vector.broadcast %cst_20 : f32 to vector<1x8xf32>
      %23 = arith.maximumf %21, %22 : vector<1x8xf32>
      %24 = arith.truncf %23 : vector<1x8xf32> to vector<1x8xbf16>
      %c0_21 = arith.constant 0 : index
      %c0_22 = arith.constant 0 : index
      %25 = vector.load %arg6[%c0_21, %c0_22] : memref<8x16xbf16, #tpu.memory_space<vmem>>, vector<8x16xbf16>
      %cst_23 = arith.constant dense<0.000000e+00> : vector<1x16xf32>
      %26 = tpu.matmul %24, %25, %cst_23 {dimension_numbers = #tpu.dot_dimension_numbers<[1], [0], [0], [1], [0, 0, 1, 1], [], []>} : vector<1x8xbf16>, vector<8x16xbf16>, vector<1x16xf32> -> vector<1x16xf32>
      %c0_24 = arith.constant 0 : index
      %c0_25 = arith.constant 0 : index
      %27 = vector.load %arg7[%c0_24, %c0_25] : memref<1x16xf32, #tpu.memory_space<vmem>>, vector<1x16xf32>
      %28 = arith.addf %26, %27 : vector<1x16xf32>
      %cst_26 = arith.constant 0.000000e+00 : f32
      %29 = vector.broadcast %cst_26 : f32 to vector<1x16xf32>
      %30 = arith.maximumf %28, %29 : vector<1x16xf32>
      %c0_27 = arith.constant 0 : index
      %c0_28 = arith.constant 0 : index
      %31 = vector.load %arg8[%c0_27, %c0_28] : memref<1x16xf32, #tpu.memory_space<vmem>>, vector<1x16xf32>
      tpu.vector_store %arg8[%c0_27, %c0_28], %30 {strides = array<i32>} : memref<1x16xf32, #tpu.memory_space<vmem>>, vector<1x16xf32>,
    } else {
    }
    return
  }
  func.func @transform_0(%arg0: i32) -> (i32, i32) {
    %c0_i32 = arith.constant 0 : i32
    %c0_i32_0 = arith.constant 0 : i32
    return %c0_i32, %arg0 : i32, i32
  }
  func.func @transform_1(%arg0: i32) -> (i32, i32) {
    %c0_i32 = arith.constant 0 : i32
    %c0_i32_0 = arith.constant 0 : i32
    return %arg0, %c0_i32 : i32, i32
  }
  func.func @transform_2(%arg0: i32) -> (i32, i32) {
    %c0_i32 = arith.constant 0 : i32
    %c0_i32_0 = arith.constant 0 : i32
    %c0_i32_1 = arith.constant 0 : i32
    return %c0_i32, %c0_i32_0 : i32, i32
  }
  func.func @transform_3(%arg0: i32) -> (i32, i32) {
    %c0_i32 = arith.constant 0 : i32
    %c0_i32_0 = arith.constant 0 : i32
    %c0_i32_1 = arith.constant 0 : i32
    return %c0_i32, %c0_i32_0 : i32, i32
  }
  func.func @transform_4(%arg0: i32) -> (i32, i32) {
    %c0_i32 = arith.constant 0 : i32
    %c0_i32_0 = arith.constant 0 : i32
    %c0_i32_1 = arith.constant 0 : i32
    return %c0_i32, %c0_i32_0 : i32, i32
  }
  func.func @transform_5(%arg0: i32) -> (i32, i32) {
    %c0_i32 = arith.constant 0 : i32
    %c0_i32_0 = arith.constant 0 : i32
    %c0_i32_1 = arith.constant 0 : i32
    return %c0_i32, %c0_i32_0 : i32, i32
  }
  func.func @transform_6(%arg0: i32) -> (i32, i32) {
    %c0_i32 = arith.constant 0 : i32
    %c0_i32_0 = arith.constant 0 : i32
    %c0_i32_1 = arith.constant 0 : i32
    return %c0_i32, %c0_i32_0 : i32, i32
  }
  func.func @transform_7(%arg0: i32) -> (i32, i32) {
    %c0_i32 = arith.constant 0 : i32
    %c0_i32_0 = arith.constant 0 : i32
    %c0_i32_1 = arith.constant 0 : i32
    return %c0_i32, %c0_i32_0 : i32, i32
  }
}

module attributes {stable_mosaic.version = 11 : i64} {
  func.func @_linear_relu_kernel(%arg0: i32, %arg1: memref<1x16xbf16, #tpu.memory_space<vmem>>, %arg2: memref<16x128xbf16, #tpu.memory_space<vmem>>, %arg3: memref<1x128xf32, #tpu.memory_space<vmem>>, %arg4: memref<1x128xf32, #tpu.memory_space<vmem>>) attributes {dimension_semantics = [#tpu.dimension_semantics<parallel>], iteration_bounds = array<i64: 1>, scalar_prefetch = 0 : i64, scratch_operands = 0 : i64, tpu.core_type = #tpu.core_type<tc>, window_params = [{pipeline_mode = #tpu.pipeline_mode<synchronous>, transform_indices = @transform_0, window_bounds = array<i64: 1, 16>}, {transform_indices = @transform_1, window_bounds = array<i64: 16, 128>}, {transform_indices = @transform_2, window_bounds = array<i64: 1, 128>}, {transform_indices = @transform_3, window_bounds = array<i64: 1, 128>}]} {
    %c0 = arith.constant 0 : index
    %c0_0 = arith.constant 0 : index
    %0 = vector.load %arg1[%c0, %c0_0] : memref<1x16xbf16, #tpu.memory_space<vmem>>, vector<1x16xbf16>
    %c0_1 = arith.constant 0 : index
    %c0_2 = arith.constant 0 : index
    %1 = vector.load %arg2[%c0_1, %c0_2] : memref<16x128xbf16, #tpu.memory_space<vmem>>, vector<16x128xbf16>
    %cst = arith.constant dense<0.000000e+00> : vector<1x128xf32>
    %2 = tpu.matmul %0, %1, %cst {dimension_numbers = #tpu.dot_dimension_numbers<[1], [0], [0], [1], [0, 0, 1, 1], [], []>} : vector<1x16xbf16>, vector<16x128xbf16>, vector<1x128xf32> -> vector<1x128xf32>
    %c0_3 = arith.constant 0 : index
    %c0_4 = arith.constant 0 : index
    %3 = vector.load %arg3[%c0_3, %c0_4] : memref<1x128xf32, #tpu.memory_space<vmem>>, vector<1x128xf32>
    %4 = arith.addf %2, %3 : vector<1x128xf32>
    %cst_5 = arith.constant 0.000000e+00 : f32
    %5 = vector.broadcast %cst_5 : f32 to vector<1x128xf32>
    %6 = arith.maximumf %4, %5 : vector<1x128xf32>
    %c0_6 = arith.constant 0 : index
    %c0_7 = arith.constant 0 : index
    %7 = vector.load %arg4[%c0_6, %c0_7] : memref<1x128xf32, #tpu.memory_space<vmem>>, vector<1x128xf32>
    tpu.vector_store %arg4[%c0_6, %c0_7], %6 {strides = array<i32>} : memref<1x128xf32, #tpu.memory_space<vmem>>, vector<1x128xf32>,
    return
  }
  func.func @transform_0(%arg0: i32) -> (i32, i32) {
    %c0_i32 = arith.constant 0 : i32
    %c0_i32_0 = arith.constant 0 : i32
    %c0_i32_1 = arith.constant 0 : i32
    return %c0_i32, %c0_i32_0 : i32, i32
  }
  func.func @transform_1(%arg0: i32) -> (i32, i32) {
    %c0_i32 = arith.constant 0 : i32
    %c0_i32_0 = arith.constant 0 : i32
    return %c0_i32, %arg0 : i32, i32
  }
  func.func @transform_2(%arg0: i32) -> (i32, i32) {
    %c0_i32 = arith.constant 0 : i32
    %c0_i32_0 = arith.constant 0 : i32
    return %c0_i32, %arg0 : i32, i32
  }
  func.func @transform_3(%arg0: i32) -> (i32, i32) {
    %c0_i32 = arith.constant 0 : i32
    %c0_i32_0 = arith.constant 0 : i32
    return %c0_i32, %arg0 : i32, i32
  }
}

module attributes {stable_mosaic.version = 11 : i64} {
  func.func @_conv_bn_relu_resident_kernel(%arg0: i32, %arg1: memref<8x144xbf16, #tpu.memory_space<vmem>>, %arg2: memref<144x32xbf16, #tpu.memory_space<vmem>>, %arg3: memref<8x1xf32, #tpu.memory_space<vmem>>, %arg4: memref<8x1xf32, #tpu.memory_space<vmem>>, %arg5: memref<8x32xf32, #tpu.memory_space<vmem>>) attributes {dimension_semantics = [#tpu.dimension_semantics<arbitrary>], iteration_bounds = array<i64: 1>, scalar_prefetch = 0 : i64, scratch_operands = 0 : i64, tpu.core_type = #tpu.core_type<tc>, window_params = [{transform_indices = @transform_0, window_bounds = array<i64: 8, 144>}, {transform_indices = @transform_1, window_bounds = array<i64: 144, 32>}, {pipeline_mode = #tpu.pipeline_mode<synchronous>, transform_indices = @transform_2, window_bounds = array<i64: 8, 1>}, {pipeline_mode = #tpu.pipeline_mode<synchronous>, transform_indices = @transform_3, window_bounds = array<i64: 8, 1>}, {pipeline_mode = #tpu.pipeline_mode<synchronous>, transform_indices = @transform_4, window_bounds = array<i64: 8, 32>}]} {
    %c0_i32 = arith.constant 0 : i32
    %0 = arith.cmpi eq, %arg0, %c0_i32 : i32
    %1 = arith.extui %0 : i1 to i32
    %c0_i32_0 = arith.constant 0 : i32
    %2 = arith.cmpi ne, %1, %c0_i32_0 : i32
    scf.if %2 {
      %cst_10 = arith.constant 0.000000e+00 : f32
      %12 = vector.broadcast %cst_10 : f32 to vector<8x32xf32>
      %c0_11 = arith.constant 0 : index
      %c0_12 = arith.constant 0 : index
      %13 = vector.load %arg5[%c0_11, %c0_12] : memref<8x32xf32, #tpu.memory_space<vmem>>, vector<8x32xf32>
      tpu.vector_store %arg5[%c0_11, %c0_12], %12 {strides = array<i32>} : memref<8x32xf32, #tpu.memory_space<vmem>>, vector<8x32xf32>,
    } else {
    }
    %c0 = arith.constant 0 : index
    %c0_1 = arith.constant 0 : index
    %3 = vector.load %arg5[%c0, %c0_1] : memref<8x32xf32, #tpu.memory_space<vmem>>, vector<8x32xf32>
    %c0_2 = arith.constant 0 : index
    %c0_3 = arith.constant 0 : index
    %4 = vector.load %arg1[%c0_2, %c0_3] : memref<8x144xbf16, #tpu.memory_space<vmem>>, vector<8x144xbf16>
    %c0_4 = arith.constant 0 : index
    %c0_5 = arith.constant 0 : index
    %5 = vector.load %arg2[%c0_4, %c0_5] : memref<144x32xbf16, #tpu.memory_space<vmem>>, vector<144x32xbf16>
    %cst = arith.constant dense<0.000000e+00> : vector<8x32xf32>
    %6 = tpu.matmul %4, %5, %cst {dimension_numbers = #tpu.dot_dimension_numbers<[1], [0], [0], [1], [0, 0, 1, 1], [], []>} : vector<8x144xbf16>, vector<144x32xbf16>, vector<8x32xf32> -> vector<8x32xf32>
    %7 = arith.addf %3, %6 : vector<8x32xf32>
    %c0_6 = arith.constant 0 : index
    %c0_7 = arith.constant 0 : index
    %8 = vector.load %arg5[%c0_6, %c0_7] : memref<8x32xf32, #tpu.memory_space<vmem>>, vector<8x32xf32>
    tpu.vector_store %arg5[%c0_6, %c0_7], %7 {strides = array<i32>} : memref<8x32xf32, #tpu.memory_space<vmem>>, vector<8x32xf32>,
    %c0_i32_8 = arith.constant 0 : i32
    %9 = arith.cmpi eq, %arg0, %c0_i32_8 : i32
    %10 = arith.extui %9 : i1 to i32
    %c0_i32_9 = arith.constant 0 : i32
    %11 = arith.cmpi ne, %10, %c0_i32_9 : i32
    scf.if %11 {
      %c0_10 = arith.constant 0 : index
      %c0_11 = arith.constant 0 : index
      %12 = vector.load %arg5[%c0_10, %c0_11] : memref<8x32xf32, #tpu.memory_space<vmem>>, vector<8x32xf32>
      %cst_12 = arith.constant dense<0.000000e+00> : vector<8xf32>
      %13 = vector.multi_reduction <add>, %12, %cst_12 [1] : vector<8x32xf32> to vector<8xf32>
      %14 = vector.shape_cast %13 : vector<8xf32> to vector<8x1xf32>
      %15 = arith.mulf %12, %12 : vector<8x32xf32>
      %cst_13 = arith.constant dense<0.000000e+00> : vector<8xf32>
      %16 = vector.multi_reduction <add>, %15, %cst_13 [1] : vector<8x32xf32> to vector<8xf32>
      %17 = vector.shape_cast %16 : vector<8xf32> to vector<8x1xf32>
      %cst_14 = arith.constant 3.125000e-02 : f32
      %18 = vector.broadcast %cst_14 : f32 to vector<8x1xf32>
      %19 = arith.mulf %14, %18 : vector<8x1xf32>
      %cst_15 = arith.constant 3.125000e-02 : f32
      %20 = vector.broadcast %cst_15 : f32 to vector<8x1xf32>
      %21 = arith.mulf %17, %20 : vector<8x1xf32>
      %22 = arith.mulf %19, %19 : vector<8x1xf32>
      %23 = arith.subf %21, %22 : vector<8x1xf32>
      %cst_16 = arith.constant 0.000000e+00 : f32
      %24 = vector.broadcast %cst_16 : f32 to vector<8x1xf32>
      %25 = arith.maximumf %23, %24 : vector<8x1xf32>
      %c0_17 = arith.constant 0 : index
      %c0_18 = arith.constant 0 : index
      %26 = vector.load %arg3[%c0_17, %c0_18] : memref<8x1xf32, #tpu.memory_space<vmem>>, vector<8x1xf32>
      %cst_19 = arith.constant 9.99999974E-6 : f32
      %27 = vector.broadcast %cst_19 : f32 to vector<8x1xf32>
      %28 = arith.addf %25, %27 : vector<8x1xf32>
      %29 = math.rsqrt %28 : vector<8x1xf32>
      %30 = arith.mulf %26, %29 : vector<8x1xf32>
      %c0_20 = arith.constant 0 : index
      %c0_21 = arith.constant 0 : index
      %31 = vector.load %arg4[%c0_20, %c0_21] : memref<8x1xf32, #tpu.memory_space<vmem>>, vector<8x1xf32>
      %32 = arith.mulf %19, %30 : vector<8x1xf32>
      %33 = arith.subf %31, %32 : vector<8x1xf32>
      %34 = vector.broadcast %30 : vector<8x1xf32> to vector<8x32xf32>
      %35 = arith.mulf %12, %34 : vector<8x32xf32>
      %36 = vector.broadcast %33 : vector<8x1xf32> to vector<8x32xf32>
      %37 = arith.addf %35, %36 : vector<8x32xf32>
      %cst_22 = arith.constant 0.000000e+00 : f32
      %38 = vector.broadcast %cst_22 : f32 to vector<8x32xf32>
      %39 = arith.maximumf %37, %38 : vector<8x32xf32>
      %c0_23 = arith.constant 0 : index
      %c0_24 = arith.constant 0 : index
      %40 = vector.load %arg5[%c0_23, %c0_24] : memref<8x32xf32, #tpu.memory_space<vmem>>, vector<8x32xf32>
      tpu.vector_store %arg5[%c0_23, %c0_24], %39 {strides = array<i32>} : memref<8x32xf32, #tpu.memory_space<vmem>>, vector<8x32xf32>,
    } else {
    }
    return
  }
  func.func @transform_0(%arg0: i32) -> (i32, i32) {
    %c0_i32 = arith.constant 0 : i32
    %c0_i32_0 = arith.constant 0 : i32
    return %c0_i32, %arg0 : i32, i32
  }
  func.func @transform_1(%arg0: i32) -> (i32, i32) {
    %c0_i32 = arith.constant 0 : i32
    %c0_i32_0 = arith.constant 0 : i32
    return %arg0, %c0_i32 : i32, i32
  }
  func.func @transform_2(%arg0: i32) -> (i32, i32) {
    %c0_i32 = arith.constant 0 : i32
    %c0_i32_0 = arith.constant 0 : i32
    %c0_i32_1 = arith.constant 0 : i32
    return %c0_i32, %c0_i32_0 : i32, i32
  }
  func.func @transform_3(%arg0: i32) -> (i32, i32) {
    %c0_i32 = arith.constant 0 : i32
    %c0_i32_0 = arith.constant 0 : i32
    %c0_i32_1 = arith.constant 0 : i32
    return %c0_i32, %c0_i32_0 : i32, i32
  }
  func.func @transform_4(%arg0: i32) -> (i32, i32) {
    %c0_i32 = arith.constant 0 : i32
    %c0_i32_0 = arith.constant 0 : i32
    %c0_i32_1 = arith.constant 0 : i32
    return %c0_i32, %c0_i32_0 : i32, i32
  }
}

module attributes {stable_mosaic.version = 11 : i64} {
  func.func @_conv_bn_relu_resident_kernel(%arg0: i32, %arg1: memref<4x200xbf16, #tpu.memory_space<vmem>>, %arg2: memref<200x128xbf16, #tpu.memory_space<vmem>>, %arg3: memref<4x1xf32, #tpu.memory_space<vmem>>, %arg4: memref<4x1xf32, #tpu.memory_space<vmem>>, %arg5: memref<4x128xf32, #tpu.memory_space<vmem>>) attributes {dimension_semantics = [#tpu.dimension_semantics<arbitrary>], iteration_bounds = array<i64: 1>, scalar_prefetch = 0 : i64, scratch_operands = 0 : i64, tpu.core_type = #tpu.core_type<tc>, window_params = [{transform_indices = @transform_0, window_bounds = array<i64: 4, 200>}, {transform_indices = @transform_1, window_bounds = array<i64: 200, 128>}, {pipeline_mode = #tpu.pipeline_mode<synchronous>, transform_indices = @transform_2, window_bounds = array<i64: 4, 1>}, {pipeline_mode = #tpu.pipeline_mode<synchronous>, transform_indices = @transform_3, window_bounds = array<i64: 4, 1>}, {pipeline_mode = #tpu.pipeline_mode<synchronous>, transform_indices = @transform_4, window_bounds = array<i64: 4, 128>}]} {
    %c0_i32 = arith.constant 0 : i32
    %0 = arith.cmpi eq, %arg0, %c0_i32 : i32
    %1 = arith.extui %0 : i1 to i32
    %c0_i32_0 = arith.constant 0 : i32
    %2 = arith.cmpi ne, %1, %c0_i32_0 : i32
    scf.if %2 {
      %cst_10 = arith.constant 0.000000e+00 : f32
      %12 = vector.broadcast %cst_10 : f32 to vector<4x128xf32>
      %c0_11 = arith.constant 0 : index
      %c0_12 = arith.constant 0 : index
      %13 = vector.load %arg5[%c0_11, %c0_12] : memref<4x128xf32, #tpu.memory_space<vmem>>, vector<4x128xf32>
      tpu.vector_store %arg5[%c0_11, %c0_12], %12 {strides = array<i32>} : memref<4x128xf32, #tpu.memory_space<vmem>>, vector<4x128xf32>,
    } else {
    }
    %c0 = arith.constant 0 : index
    %c0_1 = arith.constant 0 : index
    %3 = vector.load %arg5[%c0, %c0_1] : memref<4x128xf32, #tpu.memory_space<vmem>>, vector<4x128xf32>
    %c0_2 = arith.constant 0 : index
    %c0_3 = arith.constant 0 : index
    %4 = vector.load %arg1[%c0_2, %c0_3] : memref<4x200xbf16, #tpu.memory_space<vmem>>, vector<4x200xbf16>
    %c0_4 = arith.constant 0 : index
    %c0_5 = arith.constant 0 : index
    %5 = vector.load %arg2[%c0_4, %c0_5] : memref<200x128xbf16, #tpu.memory_space<vmem>>, vector<200x128xbf16>
    %cst = arith.constant dense<0.000000e+00> : vector<4x128xf32>
    %6 = tpu.matmul %4, %5, %cst {dimension_numbers = #tpu.dot_dimension_numbers<[1], [0], [0], [1], [0, 0, 1, 1], [], []>} : vector<4x200xbf16>, vector<200x128xbf16>, vector<4x128xf32> -> vector<4x128xf32>
    %7 = arith.addf %3, %6 : vector<4x128xf32>
    %c0_6 = arith.constant 0 : index
    %c0_7 = arith.constant 0 : index
    %8 = vector.load %arg5[%c0_6, %c0_7] : memref<4x128xf32, #tpu.memory_space<vmem>>, vector<4x128xf32>
    tpu.vector_store %arg5[%c0_6, %c0_7], %7 {strides = array<i32>} : memref<4x128xf32, #tpu.memory_space<vmem>>, vector<4x128xf32>,
    %c0_i32_8 = arith.constant 0 : i32
    %9 = arith.cmpi eq, %arg0, %c0_i32_8 : i32
    %10 = arith.extui %9 : i1 to i32
    %c0_i32_9 = arith.constant 0 : i32
    %11 = arith.cmpi ne, %10, %c0_i32_9 : i32
    scf.if %11 {
      %c0_10 = arith.constant 0 : index
      %c0_11 = arith.constant 0 : index
      %12 = vector.load %arg5[%c0_10, %c0_11] : memref<4x128xf32, #tpu.memory_space<vmem>>, vector<4x128xf32>
      %cst_12 = arith.constant dense<0.000000e+00> : vector<4xf32>
      %13 = vector.multi_reduction <add>, %12, %cst_12 [1] : vector<4x128xf32> to vector<4xf32>
      %14 = vector.shape_cast %13 : vector<4xf32> to vector<4x1xf32>
      %15 = arith.mulf %12, %12 : vector<4x128xf32>
      %cst_13 = arith.constant dense<0.000000e+00> : vector<4xf32>
      %16 = vector.multi_reduction <add>, %15, %cst_13 [1] : vector<4x128xf32> to vector<4xf32>
      %17 = vector.shape_cast %16 : vector<4xf32> to vector<4x1xf32>
      %cst_14 = arith.constant 7.812500e-03 : f32
      %18 = vector.broadcast %cst_14 : f32 to vector<4x1xf32>
      %19 = arith.mulf %14, %18 : vector<4x1xf32>
      %cst_15 = arith.constant 7.812500e-03 : f32
      %20 = vector.broadcast %cst_15 : f32 to vector<4x1xf32>
      %21 = arith.mulf %17, %20 : vector<4x1xf32>
      %22 = arith.mulf %19, %19 : vector<4x1xf32>
      %23 = arith.subf %21, %22 : vector<4x1xf32>
      %cst_16 = arith.constant 0.000000e+00 : f32
      %24 = vector.broadcast %cst_16 : f32 to vector<4x1xf32>
      %25 = arith.maximumf %23, %24 : vector<4x1xf32>
      %c0_17 = arith.constant 0 : index
      %c0_18 = arith.constant 0 : index
      %26 = vector.load %arg3[%c0_17, %c0_18] : memref<4x1xf32, #tpu.memory_space<vmem>>, vector<4x1xf32>
      %cst_19 = arith.constant 9.99999974E-6 : f32
      %27 = vector.broadcast %cst_19 : f32 to vector<4x1xf32>
      %28 = arith.addf %25, %27 : vector<4x1xf32>
      %29 = math.rsqrt %28 : vector<4x1xf32>
      %30 = arith.mulf %26, %29 : vector<4x1xf32>
      %c0_20 = arith.constant 0 : index
      %c0_21 = arith.constant 0 : index
      %31 = vector.load %arg4[%c0_20, %c0_21] : memref<4x1xf32, #tpu.memory_space<vmem>>, vector<4x1xf32>
      %32 = arith.mulf %19, %30 : vector<4x1xf32>
      %33 = arith.subf %31, %32 : vector<4x1xf32>
      %34 = vector.broadcast %30 : vector<4x1xf32> to vector<4x128xf32>
      %35 = arith.mulf %12, %34 : vector<4x128xf32>
      %36 = vector.broadcast %33 : vector<4x1xf32> to vector<4x128xf32>
      %37 = arith.addf %35, %36 : vector<4x128xf32>
      %cst_22 = arith.constant 0.000000e+00 : f32
      %38 = vector.broadcast %cst_22 : f32 to vector<4x128xf32>
      %39 = arith.maximumf %37, %38 : vector<4x128xf32>
      %c0_23 = arith.constant 0 : index
      %c0_24 = arith.constant 0 : index
      %40 = vector.load %arg5[%c0_23, %c0_24] : memref<4x128xf32, #tpu.memory_space<vmem>>, vector<4x128xf32>
      tpu.vector_store %arg5[%c0_23, %c0_24], %39 {strides = array<i32>} : memref<4x128xf32, #tpu.memory_space<vmem>>, vector<4x128xf32>,
    } else {
    }
    return
  }
  func.func @transform_0(%arg0: i32) -> (i32, i32) {
    %c0_i32 = arith.constant 0 : i32
    %c0_i32_0 = arith.constant 0 : i32
    return %c0_i32, %arg0 : i32, i32
  }
  func.func @transform_1(%arg0: i32) -> (i32, i32) {
    %c0_i32 = arith.constant 0 : i32
    %c0_i32_0 = arith.constant 0 : i32
    return %arg0, %c0_i32 : i32, i32
  }
  func.func @transform_2(%arg0: i32) -> (i32, i32) {
    %c0_i32 = arith.constant 0 : i32
    %c0_i32_0 = arith.constant 0 : i32
    %c0_i32_1 = arith.constant 0 : i32
    return %c0_i32, %c0_i32_0 : i32, i32
  }
  func.func @transform_3(%arg0: i32) -> (i32, i32) {
    %c0_i32 = arith.constant 0 : i32
    %c0_i32_0 = arith.constant 0 : i32
    %c0_i32_1 = arith.constant 0 : i32
    return %c0_i32, %c0_i32_0 : i32, i32
  }
  func.func @transform_4(%arg0: i32) -> (i32, i32) {
    %c0_i32 = arith.constant 0 : i32
    %c0_i32_0 = arith.constant 0 : i32
    %c0_i32_1 = arith.constant 0 : i32
    return %c0_i32, %c0_i32_0 : i32, i32
  }
}

module attributes {stable_mosaic.version = 11 : i64} {
  func.func @_conv_bn_relu_resident_kernel(%arg0: i32, %arg1: memref<3x36xbf16, #tpu.memory_space<vmem>>, %arg2: memref<36x512xbf16, #tpu.memory_space<vmem>>, %arg3: memref<3x1xf32, #tpu.memory_space<vmem>>, %arg4: memref<3x1xf32, #tpu.memory_space<vmem>>, %arg5: memref<3x512xf32, #tpu.memory_space<vmem>>) attributes {dimension_semantics = [#tpu.dimension_semantics<arbitrary>], iteration_bounds = array<i64: 1>, scalar_prefetch = 0 : i64, scratch_operands = 0 : i64, tpu.core_type = #tpu.core_type<tc>, window_params = [{transform_indices = @transform_0, window_bounds = array<i64: 3, 36>}, {transform_indices = @transform_1, window_bounds = array<i64: 36, 512>}, {pipeline_mode = #tpu.pipeline_mode<synchronous>, transform_indices = @transform_2, window_bounds = array<i64: 3, 1>}, {pipeline_mode = #tpu.pipeline_mode<synchronous>, transform_indices = @transform_3, window_bounds = array<i64: 3, 1>}, {pipeline_mode = #tpu.pipeline_mode<synchronous>, transform_indices = @transform_4, window_bounds = array<i64: 3, 512>}]} {
    %c0_i32 = arith.constant 0 : i32
    %0 = arith.cmpi eq, %arg0, %c0_i32 : i32
    %1 = arith.extui %0 : i1 to i32
    %c0_i32_0 = arith.constant 0 : i32
    %2 = arith.cmpi ne, %1, %c0_i32_0 : i32
    scf.if %2 {
      %cst_10 = arith.constant 0.000000e+00 : f32
      %12 = vector.broadcast %cst_10 : f32 to vector<3x512xf32>
      %c0_11 = arith.constant 0 : index
      %c0_12 = arith.constant 0 : index
      %13 = vector.load %arg5[%c0_11, %c0_12] : memref<3x512xf32, #tpu.memory_space<vmem>>, vector<3x512xf32>
      tpu.vector_store %arg5[%c0_11, %c0_12], %12 {strides = array<i32>} : memref<3x512xf32, #tpu.memory_space<vmem>>, vector<3x512xf32>,
    } else {
    }
    %c0 = arith.constant 0 : index
    %c0_1 = arith.constant 0 : index
    %3 = vector.load %arg5[%c0, %c0_1] : memref<3x512xf32, #tpu.memory_space<vmem>>, vector<3x512xf32>
    %c0_2 = arith.constant 0 : index
    %c0_3 = arith.constant 0 : index
    %4 = vector.load %arg1[%c0_2, %c0_3] : memref<3x36xbf16, #tpu.memory_space<vmem>>, vector<3x36xbf16>
    %c0_4 = arith.constant 0 : index
    %c0_5 = arith.constant 0 : index
    %5 = vector.load %arg2[%c0_4, %c0_5] : memref<36x512xbf16, #tpu.memory_space<vmem>>, vector<36x512xbf16>
    %cst = arith.constant dense<0.000000e+00> : vector<3x512xf32>
    %6 = tpu.matmul %4, %5, %cst {dimension_numbers = #tpu.dot_dimension_numbers<[1], [0], [0], [1], [0, 0, 1, 1], [], []>} : vector<3x36xbf16>, vector<36x512xbf16>, vector<3x512xf32> -> vector<3x512xf32>
    %7 = arith.addf %3, %6 : vector<3x512xf32>
    %c0_6 = arith.constant 0 : index
    %c0_7 = arith.constant 0 : index
    %8 = vector.load %arg5[%c0_6, %c0_7] : memref<3x512xf32, #tpu.memory_space<vmem>>, vector<3x512xf32>
    tpu.vector_store %arg5[%c0_6, %c0_7], %7 {strides = array<i32>} : memref<3x512xf32, #tpu.memory_space<vmem>>, vector<3x512xf32>,
    %c0_i32_8 = arith.constant 0 : i32
    %9 = arith.cmpi eq, %arg0, %c0_i32_8 : i32
    %10 = arith.extui %9 : i1 to i32
    %c0_i32_9 = arith.constant 0 : i32
    %11 = arith.cmpi ne, %10, %c0_i32_9 : i32
    scf.if %11 {
      %c0_10 = arith.constant 0 : index
      %c0_11 = arith.constant 0 : index
      %12 = vector.load %arg5[%c0_10, %c0_11] : memref<3x512xf32, #tpu.memory_space<vmem>>, vector<3x512xf32>
      %cst_12 = arith.constant dense<0.000000e+00> : vector<3xf32>
      %13 = vector.multi_reduction <add>, %12, %cst_12 [1] : vector<3x512xf32> to vector<3xf32>
      %14 = vector.shape_cast %13 : vector<3xf32> to vector<3x1xf32>
      %15 = arith.mulf %12, %12 : vector<3x512xf32>
      %cst_13 = arith.constant dense<0.000000e+00> : vector<3xf32>
      %16 = vector.multi_reduction <add>, %15, %cst_13 [1] : vector<3x512xf32> to vector<3xf32>
      %17 = vector.shape_cast %16 : vector<3xf32> to vector<3x1xf32>
      %cst_14 = arith.constant 0.001953125 : f32
      %18 = vector.broadcast %cst_14 : f32 to vector<3x1xf32>
      %19 = arith.mulf %14, %18 : vector<3x1xf32>
      %cst_15 = arith.constant 0.001953125 : f32
      %20 = vector.broadcast %cst_15 : f32 to vector<3x1xf32>
      %21 = arith.mulf %17, %20 : vector<3x1xf32>
      %22 = arith.mulf %19, %19 : vector<3x1xf32>
      %23 = arith.subf %21, %22 : vector<3x1xf32>
      %cst_16 = arith.constant 0.000000e+00 : f32
      %24 = vector.broadcast %cst_16 : f32 to vector<3x1xf32>
      %25 = arith.maximumf %23, %24 : vector<3x1xf32>
      %c0_17 = arith.constant 0 : index
      %c0_18 = arith.constant 0 : index
      %26 = vector.load %arg3[%c0_17, %c0_18] : memref<3x1xf32, #tpu.memory_space<vmem>>, vector<3x1xf32>
      %cst_19 = arith.constant 9.99999974E-6 : f32
      %27 = vector.broadcast %cst_19 : f32 to vector<3x1xf32>
      %28 = arith.addf %25, %27 : vector<3x1xf32>
      %29 = math.rsqrt %28 : vector<3x1xf32>
      %30 = arith.mulf %26, %29 : vector<3x1xf32>
      %c0_20 = arith.constant 0 : index
      %c0_21 = arith.constant 0 : index
      %31 = vector.load %arg4[%c0_20, %c0_21] : memref<3x1xf32, #tpu.memory_space<vmem>>, vector<3x1xf32>
      %32 = arith.mulf %19, %30 : vector<3x1xf32>
      %33 = arith.subf %31, %32 : vector<3x1xf32>
      %34 = vector.broadcast %30 : vector<3x1xf32> to vector<3x512xf32>
      %35 = arith.mulf %12, %34 : vector<3x512xf32>
      %36 = vector.broadcast %33 : vector<3x1xf32> to vector<3x512xf32>
      %37 = arith.addf %35, %36 : vector<3x512xf32>
      %cst_22 = arith.constant 0.000000e+00 : f32
      %38 = vector.broadcast %cst_22 : f32 to vector<3x512xf32>
      %39 = arith.maximumf %37, %38 : vector<3x512xf32>
      %c0_23 = arith.constant 0 : index
      %c0_24 = arith.constant 0 : index
      %40 = vector.load %arg5[%c0_23, %c0_24] : memref<3x512xf32, #tpu.memory_space<vmem>>, vector<3x512xf32>
      tpu.vector_store %arg5[%c0_23, %c0_24], %39 {strides = array<i32>} : memref<3x512xf32, #tpu.memory_space<vmem>>, vector<3x512xf32>,
    } else {
    }
    return
  }
  func.func @transform_0(%arg0: i32) -> (i32, i32) {
    %c0_i32 = arith.constant 0 : i32
    %c0_i32_0 = arith.constant 0 : i32
    return %c0_i32, %arg0 : i32, i32
  }
  func.func @transform_1(%arg0: i32) -> (i32, i32) {
    %c0_i32 = arith.constant 0 : i32
    %c0_i32_0 = arith.constant 0 : i32
    return %arg0, %c0_i32 : i32, i32
  }
  func.func @transform_2(%arg0: i32) -> (i32, i32) {
    %c0_i32 = arith.constant 0 : i32
    %c0_i32_0 = arith.constant 0 : i32
    %c0_i32_1 = arith.constant 0 : i32
    return %c0_i32, %c0_i32_0 : i32, i32
  }
  func.func @transform_3(%arg0: i32) -> (i32, i32) {
    %c0_i32 = arith.constant 0 : i32
    %c0_i32_0 = arith.constant 0 : i32
    %c0_i32_1 = arith.constant 0 : i32
    return %c0_i32, %c0_i32_0 : i32, i32
  }
  func.func @transform_4(%arg0: i32) -> (i32, i32) {
    %c0_i32 = arith.constant 0 : i32
    %c0_i32_0 = arith.constant 0 : i32
    %c0_i32_1 = arith.constant 0 : i32
    return %c0_i32, %c0_i32_0 : i32, i32
  }
}

</mosaic_0001>

<bundles_post_ra>
// kernel: ae_batch_norm_forward.8
= control target key start
LH: loop header
LB: loop body
LE: loop exit
PB: predicated region body
PF: predicated region fallthrough
CT: control target
= control target key end

     0   :  { %vm44_vm0 = vcmask 1044480   ;;  %vm45_vm1 = vcmask 1045504   ;;  %v159_v0 = vmov 0.0   ;;  %v160_v2 = vmov 65535   ;;  %s218_s4 = inlined_call_operand.vmem [shape: f32[4,128], index: 4, kind: output, shape index: {}]   ;;  %s219_s1 = inlined_call_operand.vmem [shape: bf16[27,128], index: 1, kind: input, shape index: {}]   ;;  %s220_s0 = inlined_call_operand.vmem [shape: bf16[4,27], index: 0, kind: input, shape index: {}]   ;;  %s221_s2 = inlined_call_operand.vmem [shape: f32[4,1], index: 2, kind: input, shape index: {}]   ;;  %s222_s3 = inlined_call_operand.vmem [shape: f32[4,1], index: 3, kind: input, shape index: {}]  }
   0x1   :  { %22 = vst [vmem:[%s218_s4] sm:$0xf] %v159_v0  ;;  %141 = vmatprep.subr.bf16.mxu0 %v159_v0  ;;  %v155_v1 = vld [vmem:[%s219_s1] sm:$0xff]   ;;  %v46_v3 = vsel %vm44_vm0, 4294967295, %v160_v2  ;;  %v156_v4 = vld [vmem:[%s219_s1 + $0x8] sm:$0x3f]   ;;  %vm161_vm2 = vmmov 0  }
   0x2   :  { %142 = vmatpush3.bf16.msra.mxu0 %v155_v1  ;;  %v47_v5 = vsel %vm45_vm1, %v46_v3, 0  ;;  %145 = vmatprep.mubr.msk.bf16.mxu0 %vm161_vm2, %v159_v0  ;;  %v24_v7 = vld [vmem:[%s220_s0] sm:$0x3]  ;;  %vm40_vm3 = vcmask 220160   ;;  %vm97_vm4 = vcmask 1043456   ;;  %v162_v18 = vmov 0  }
   0x3   :  { %143 = vmatprep.subr.bf16.mxu0 %v159_v0  ;;  %v49_v6 = vand.u32 %v156_v4, %v47_v5  ;;  %153 = vset.pattern.permute.xlu1 %v162_v18  ;;  %v110_v27 = vld [vmem:[%s221_s2] sm:$0xf] }
   0x4   :  { %154 = vset.pattern.permute.xlu0 %v162_v18  ;;  %v114_v30 = vld [vmem:[%s222_s3] sm:$0xf] }
   0x6   :  { %144 = vmatpush3.bf16.msra.mxu0 %v49_v6 }
   0x8   :  { %v23_v8 = vld [vmem:[%s218_s4] sm:$0xf] }
   0x9   :  { %146 = vmatmul.mubr.msk.bf16.vlgmr.msra.gmra.mrb[0].mxu0 %vm40_vm3, %v24_v7 }
  0xdc   :  { %v85_v9 = vpop.f32.mrb[0].mxu0 }
  0xdd   :  { %v91_v10 = vadd.f32 %v85_v9, %v23_v8  ;;  %v147_v11 = vpop.f32.mrb[1].mxu0 }
  0xde   :  { %v88_v12 = vpop.f32.mrb[2].mxu0 }
  0xdf   :  { %92 = vst [vmem:[%s218_s4] sm:$0xf] %v91_v10  ;;  %v148_v13 = vpop.f32.mrb[3].mxu0 }
  0xe6   :  { %v96_v14 = vld [vmem:[%s218_s4] sm:$0xf] }
  0xe7   :  { %v98_v15 = vsel %vm97_vm4, %v96_v14, 0.0  ;;  %v101_v16 = vmul.f32 %v96_v14, %v96_v14 }
  0xe8   :  { %99 = vadd.xlane.f32.xlu0 %v98_v15 }
  0xe9   :  { %v102_v17 = vsel %vm97_vm4, %v101_v16, 0.0 }
  0xec   :  { %103 = vadd.xlane.f32.xlu0 %v102_v17 }
 0x175   :  { %v100_v19 = vpop.xlane.xlu0 %99 }
 0x176   :  { %v105_v20 = vmul.f32 0.0078125, %v100_v19 }
 0x178   :  { %v107_v22 = vmul.f32 %v105_v20, %v105_v20 }
 0x179   :  { %v104_v21 = vpop.xlane.xlu0 %103 }
 0x17a   :  { %v106_v23 = vmul.f32 0.0078125, %v104_v21 }
 0x17c   :  { %v108_v24 = vsub.f32 %v106_v23, %v107_v22 }
 0x17e   :  { %v109_v25 = vmax.f32 %v108_v24, 0.0 }
 0x180   :  { %v111_v26 = vadd.f32 1e-05, %v109_v25 }
 0x182   :  { %157 = vrsqrt.f32 %v111_v26 }
 0x18c   :  { %v158_v28 = vpop.eup %157 }
 0x18d   :  { %v113_v29 = vmul.f32 %v158_v28, %v110_v27 }
 0x18f   :  { %119 = vperm.xlu1 %153, %v113_v29   ;;  %v115_v31 = vmul.f32 %v113_v29, %v105_v20 }
 0x191   :  { %v116_v32 = vsub.f32 %v114_v30, %v115_v31 }
 0x193   :  { %125 = vperm.xlu1 %153, %v116_v32  }
 0x20e   :  { %v120_v33 = vpop.permute.xlu1 %119 }
 0x20f   :  { %v122_v34 = vmul.f32 %v120_v33, %v96_v14 }
 0x212   :  { %v126_v35 = vpop.permute.xlu1 %125 }
 0x213   :  { %v128_v36 = vadd.f32 %v126_v35, %v122_v34 }
 0x215   :  { %v129_v37 = vmax.f32 %v128_v36, 0.0 }
 0x217   :  { %130 = vst [vmem:[%s218_s4] sm:$0xf] %v129_v37 }

// kernel: ae_batch_norm_forward.9
= control target key start
LH: loop header
LB: loop body
LE: loop exit
PB: predicated region body
PF: predicated region fallthrough
CT: control target
= control target key end

     0   :  { %v218_v0 = vmov 0.0   ;;  %vm219_vm0 = vmmov 0   ;;  %vm22_vm1 = vcmask 261120   ;;  %vm82_vm2 = vcmask 1041408   ;;  %s296_s1 = inlined_call_operand.vmem [shape: bf16[100,32], index: 1, kind: input, shape index: {}]   ;;  %s297_s4 = inlined_call_operand.vmem [shape: f32[8,32], index: 4, kind: output, shape index: {}]   ;;  %s298_s0 = inlined_call_operand.vmem [shape: bf16[8,100], index: 0, kind: input, shape index: {}]   ;;  %s299_s2 = inlined_call_operand.vmem [shape: f32[8,1], index: 2, kind: input, shape index: {}]   ;;  %s300_s3 = inlined_call_operand.vmem [shape: f32[8,1], index: 3, kind: input, shape index: {}]  }
   0x1   :  { %186 = vmatprep.subr.bf16.mxu0 %v218_v0  ;;  %v209_v1 = vld [vmem:[%s296_s1] sm:$0xff]   ;;  %200 = vmatprep.mubr.msk.bf16.mxu0 %vm219_vm0, %v218_v0  ;;  %23 = vst.msk [vmem:[%s297_s4] sm:$0xff] %vm22_vm1, %v218_v0  ;;  %v210_v2 = vld [vmem:[%s296_s1 + $0x8] sm:$0xff]   ;;  %v211_v3 = vld [vmem:[%s296_s1 + $0x10] sm:$0xff]   ;;  %vm78_vm3 = vcmask 818176   ;;  %v220_v20 = vmov 0  }
   0x2   :  { %187 = vmatpush3.bf16.msra.mxu0 %v209_v1  ;;  %v212_v4 = vld [vmem:[%s296_s1 + $0x18] sm:$0xff]   ;;  %v213_v5 = vld [vmem:[%s296_s1 + $0x20] sm:$0xff]   ;;  %v214_v6 = vld [vmem:[%s296_s1 + $0x28] sm:$0xff]   ;;  %207 = vset.pattern.permute.xlu1 %v220_v20 }
   0x3   :  { %188 = vmatprep.subr.bf16.mxu0 %v218_v0  ;;  %v215_v7 = vld [vmem:[%s296_s1 + $0x30] ss:$0 sps:$4 sm:$0x33]   ;;  %v25_v9 = vld [vmem:[%s298_s0] sm:$0xf]  ;;  %208 = vset.pattern.permute.xlu0 %v220_v20 }
   0x4   :  { %v84_v8 = vsel %vm82_vm2, %v215_v7, 0  ;;  %v145_v29 = vld [vmem:[%s299_s2] sm:$0xff] }
   0x5   :  { %v149_v32 = vld [vmem:[%s300_s3] sm:$0xff] }
   0x6   :  { %189 = vmatpush3.bf16.msra.mxu0 %v210_v2 }
   0x7   :  { %190 = vmatprep.subr.bf16.mxu0 %v218_v0 }
   0x8   :  { %v24_v10 = vld [vmem:[%s297_s4] sm:$0xff] }
   0xa   :  { %191 = vmatpush3.bf16.msra.mxu0 %v211_v3 }
   0xb   :  { %192 = vmatprep.subr.bf16.mxu0 %v218_v0 }
   0xe   :  { %193 = vmatpush3.bf16.msra.mxu0 %v212_v4 }
   0xf   :  { %194 = vmatprep.subr.bf16.mxu0 %v218_v0 }
  0x12   :  { %195 = vmatpush3.bf16.msra.mxu0 %v213_v5 }
  0x13   :  { %196 = vmatprep.subr.bf16.mxu0 %v218_v0 }
  0x16   :  { %197 = vmatpush3.bf16.msra.mxu0 %v214_v6 }
  0x17   :  { %198 = vmatprep.subr.bf16.mxu0 %v218_v0 }
  0x1a   :  { %199 = vmatpush3.bf16.msra.mxu0 %v84_v8 }
  0x1d   :  { %201 = vmatmul.mubr.msk.bf16.vlgmr.msra.gmra.mrb[0].mxu0 %vm78_vm3, %v25_v9 }
  0xf0   :  { %v120_v11 = vpop.f32.mrb[0].mxu0 }
  0xf1   :  { %v126_v12 = vadd.f32 %v120_v11, %v24_v10  ;;  %v202_v13 = vpop.f32.mrb[1].mxu0 }
  0xf2   :  { %v123_v14 = vpop.f32.mrb[2].mxu0 }
  0xf3   :  { %128 = vst.msk [vmem:[%s297_s4] sm:$0xff] %vm22_vm1, %v126_v12  ;;  %v203_v15 = vpop.f32.mrb[3].mxu0 }
  0xfa   :  { %v132_v16 = vld [vmem:[%s297_s4] sm:$0xff] }
  0xfb   :  { %v133_v17 = vsel %vm22_vm1, %v132_v16, 0.0  ;;  %v136_v18 = vmul.f32 %v132_v16, %v132_v16 }
  0xfc   :  { %134 = vadd.xlane.f32.xlu0 %v133_v17 }
  0xfd   :  { %v137_v19 = vsel %vm22_vm1, %v136_v18, 0.0 }
 0x100   :  { %138 = vadd.xlane.f32.xlu0 %v137_v19 }
 0x189   :  { %v135_v21 = vpop.xlane.xlu0 %134 }
 0x18a   :  { %v140_v22 = vmul.f32 0.03125, %v135_v21 }
 0x18c   :  { %v142_v24 = vmul.f32 %v140_v22, %v140_v22 }
 0x18d   :  { %v139_v23 = vpop.xlane.xlu0 %138 }
 0x18e   :  { %v141_v25 = vmul.f32 0.03125, %v139_v23 }
 0x190   :  { %v143_v26 = vsub.f32 %v141_v25, %v142_v24 }
 0x192   :  { %v144_v27 = vmax.f32 %v143_v26, 0.0 }
 0x194   :  { %v146_v28 = vadd.f32 1e-05, %v144_v27 }
 0x196   :  { %216 = vrsqrt.f32 %v146_v28 }
 0x1a0   :  { %v217_v30 = vpop.eup %216 }
 0x1a1   :  { %v148_v31 = vmul.f32 %v217_v30, %v145_v29 }
 0x1a3   :  { %154 = vperm.xlu1 %207, %v148_v31   ;;  %v150_v33 = vmul.f32 %v148_v31, %v140_v22 }
 0x1a5   :  { %v151_v34 = vsub.f32 %v149_v32, %v150_v33 }
 0x1a7   :  { %160 = vperm.xlu1 %207, %v151_v34  }
 0x222   :  { %v155_v35 = vpop.permute.xlu1 %154 }
 0x223   :  { %v157_v36 = vmul.f32 %v155_v35, %v132_v16 }
 0x226   :  { %v161_v37 = vpop.permute.xlu1 %160 }
 0x227   :  { %v163_v38 = vadd.f32 %v161_v37, %v157_v36 }
 0x229   :  { %v164_v39 = vmax.f32 %v163_v38, 0.0 }
 0x22b   :  { %165 = vst.msk [vmem:[%s297_s4] sm:$0xff] %vm22_vm1, %v164_v39 }

// kernel: ae_batch_norm_forward.10
= control target key start
LH: loop header
LB: loop body
LE: loop exit
PB: predicated region body
PF: predicated region fallthrough
CT: control target
= control target key end

     0   :  { %v241_v0 = vmov 0.0   ;;  %vm242_vm0 = vmmov 0   ;;  %vm22_vm1 = vcmask 64512   ;;  %vm74_vm2 = vcmask 1043456   ;;  %s339_s1 = inlined_call_operand.vmem [shape: bf16[72,8], index: 1, kind: input, shape index: {}]   ;;  %s340_s4 = inlined_call_operand.vmem [shape: f32[16,8], index: 4, kind: output, shape index: {}]   ;;  %s341_s0 = inlined_call_operand.vmem [shape: bf16[16,72], index: 0, kind: input, shape index: {}]   ;;  %s342_s2 = inlined_call_operand.vmem [shape: f32[16,1], index: 2, kind: input, shape index: {}]   ;;  %s343_s3 = inlined_call_operand.vmem [shape: f32[16,1], index: 3, kind: input, shape index: {}]  }
   0x1   :  { %212 = vmatprep.subr.bf16.mxu0 %v241_v0  ;;  %v231_v1 = vld [vmem:[%s339_s1] sm:$0xff]   ;;  %222 = vmatprep.mubr.msk.bf16.mxu0 %vm242_vm0, %v241_v0  ;;  %23 = vst.msk [vmem:[%s340_s4] sm:$0xff] %vm22_vm1, %v241_v0  ;;  %24 = vst.msk [vmem:[%s340_s4 + $0x8] sm:$0xff] %vm22_vm1, %v241_v0  ;;  %v232_v2 = vld [vmem:[%s339_s1 + $0x8] sm:$0xff]   ;;  %vm70_vm3 = vcmask 588800   ;;  %v243_v24 = vmov 0  }
   0x2   :  { %213 = vmatpush3.bf16.msra.mxu0 %v231_v1  ;;  %v233_v3 = vld [vmem:[%s339_s1 + $0x10] sm:$0xff]   ;;  %v234_v4 = vld [vmem:[%s339_s1 + $0x18] sm:$0xff]   ;;  %v235_v5 = vld [vmem:[%s339_s1 + $0x20] ss:$0 sps:$4 sm:$0xff]   ;;  %229 = vset.pattern.permute.xlu0 %v243_v24 }
   0x3   :  { %214 = vmatprep.subr.bf16.mxu0 %v241_v0  ;;  %v76_v6 = vsel %vm74_vm2, %v235_v5, 0  ;;  %v236_v7 = vld [vmem:[%s341_s0] sm:$0xff]   ;;  %230 = vset.pattern.permute.xlu1 %v243_v24  ;;  %v154_v44 = vld [vmem:[%s342_s2 + $0x8] sm:$0xff] }
   0x4   :  { %v153_v41 = vld [vmem:[%s342_s2] sm:$0xff]  ;;  %v162_v51 = vld [vmem:[%s343_s3 + $0x8] sm:$0xff] }
   0x5   :  { %v161_v48 = vld [vmem:[%s343_s3] sm:$0xff] }
   0x6   :  { %215 = vmatpush3.bf16.msra.mxu0 %v232_v2 }
   0x7   :  { %216 = vmatprep.subr.bf16.mxu0 %v241_v0 }
   0x8   :  { %v25_v8 = vld [vmem:[%s340_s4] sm:$0xff]  ;;  %v26_v10 = vld [vmem:[%s340_s4 + $0x8] sm:$0xff] }
   0xa   :  { %217 = vmatpush3.bf16.msra.mxu0 %v233_v3 }
   0xb   :  { %218 = vmatprep.subr.bf16.mxu0 %v241_v0 }
   0xe   :  { %219 = vmatpush3.bf16.msra.mxu0 %v234_v4 }
   0xf   :  { %220 = vmatprep.subr.bf16.mxu0 %v241_v0 }
  0x12   :  { %221 = vmatpush3.bf16.msra.mxu0 %v76_v6 }
  0x15   :  { %223 = vmatmul.mubr.msk.bf16.vlgmr.msra.gmra.mrb[0].mxu0 %vm70_vm3, %v236_v7 }
  0xe8   :  { %v112_v9 = vpop.f32.mrb[0].mxu0 }
  0xe9   :  { %v119_v11 = vadd.f32 %v112_v9, %v25_v8  ;;  %v224_v12 = vpop.f32.mrb[1].mxu0 }
  0xea   :  { %v115_v13 = vpop.f32.mrb[2].mxu0 }
  0xeb   :  { %122 = vst.msk [vmem:[%s340_s4] sm:$0xff] %vm22_vm1, %v119_v11  ;;  %v120_v14 = vadd.f32 %v115_v13, %v26_v10  ;;  %v225_v15 = vpop.f32.mrb[3].mxu0 }
  0xed   :  { %123 = vst.msk [vmem:[%s340_s4 + $0x8] sm:$0xff] %vm22_vm1, %v120_v14 }
  0xf2   :  { %v127_v16 = vld [vmem:[%s340_s4] sm:$0xff] }
  0xf3   :  { %v129_v17 = vsel %vm22_vm1, %v127_v16, 0.0  ;;  %v135_v18 = vmul.f32 %v127_v16, %v127_v16 }
  0xf4   :  { %130 = vadd.xlane.f32.xlu0 %v129_v17  ;;  %v128_v19 = vld [vmem:[%s340_s4 + $0x8] sm:$0xff] }
  0xf5   :  { %v137_v20 = vsel %vm22_vm1, %v135_v18, 0.0  ;;  %v136_v21 = vmul.f32 %v128_v19, %v128_v19  ;;  %v132_v22 = vsel %vm22_vm1, %v128_v19, 0.0 }
  0xf6   :  { %138 = vadd.xlane.f32.xlu1 %v137_v20 }
  0xf7   :  { %v140_v23 = vsel %vm22_vm1, %v136_v21, 0.0 }
  0xf8   :  { %133 = vadd.xlane.f32.xlu0 %v132_v22 }
  0xfa   :  { %141 = vadd.xlane.f32.xlu1 %v140_v23 }
 0x181   :  { %v131_v25 = vpop.xlane.xlu0 %130 }
 0x182   :  { %v143_v26 = vmul.f32 0.125, %v131_v25 }
 0x183   :  { %v139_v27 = vpop.xlane.xlu1 %138 }
 0x184   :  { %v147_v28 = vmul.f32 %v143_v26, %v143_v26  ;;  %v145_v29 = vmul.f32 0.125, %v139_v27 }
 0x185   :  { %v134_v30 = vpop.xlane.xlu0 %133 }
 0x186   :  { %v149_v31 = vsub.f32 %v145_v29, %v147_v28  ;;  %v144_v32 = vmul.f32 0.125, %v134_v30 }
 0x187   :  { %v142_v33 = vpop.xlane.xlu1 %141 }
 0x188   :  { %v151_v34 = vmax.f32 %v149_v31, 0.0  ;;  %v148_v35 = vmul.f32 %v144_v32, %v144_v32  ;;  %v146_v36 = vmul.f32 0.125, %v142_v33 }
 0x18a   :  { %v155_v37 = vadd.f32 1e-05, %v151_v34  ;;  %v150_v38 = vsub.f32 %v146_v36, %v148_v35 }
 0x18c   :  { %237 = vrsqrt.f32 %v155_v37  ;;  %v152_v39 = vmax.f32 %v150_v38, 0.0 }
 0x18e   :  { %v156_v40 = vadd.f32 1e-05, %v152_v39 }
 0x190   :  { %239 = vrsqrt.f32 %v156_v40 }
 0x196   :  { %v238_v42 = vpop.eup %237 }
 0x197   :  { %v159_v43 = vmul.f32 %v238_v42, %v153_v41 }
 0x199   :  { %169 = vperm.xlu0 %229, %v159_v43   ;;  %v163_v47 = vmul.f32 %v159_v43, %v143_v26 }
 0x19a   :  { %v240_v45 = vpop.eup %239 }
 0x19b   :  { %v160_v46 = vmul.f32 %v240_v45, %v154_v44  ;;  %v165_v49 = vsub.f32 %v161_v48, %v163_v47 }
 0x19d   :  { %174 = vperm.xlu1 %230, %v160_v46   ;;  %v164_v50 = vmul.f32 %v160_v46, %v144_v32 }
 0x19f   :  { %v166_v52 = vsub.f32 %v162_v51, %v164_v50 }
 0x1a1   :  { %181 = vperm.xlu1 %230, %v165_v49  }
 0x1a5   :  { %186 = vperm.xlu1 %230, %v166_v52  }
 0x218   :  { %v170_v53 = vpop.permute.xlu0 %169 }
 0x219   :  { %v177_v55 = vmul.f32 %v170_v53, %v127_v16 }
 0x21c   :  { %v175_v54 = vpop.permute.xlu1 %174 }
 0x21d   :  { %v178_v58 = vmul.f32 %v175_v54, %v128_v19 }
 0x220   :  { %v182_v56 = vpop.permute.xlu1 %181 }
 0x221   :  { %v189_v57 = vadd.f32 %v182_v56, %v177_v55 }
 0x223   :  { %v191_v59 = vmax.f32 %v189_v57, 0.0 }
 0x224   :  { %v187_v60 = vpop.permute.xlu1 %186 }
 0x225   :  { %193 = vst.msk [vmem:[%s340_s4] sm:$0xff] %vm22_vm1, %v191_v59  ;;  %v190_v61 = vadd.f32 %v187_v60, %v178_v58 }
 0x227   :  { %v192_v62 = vmax.f32 %v190_v61, 0.0 }
 0x229   :  { %194 = vst.msk [vmem:[%s340_s4 + $0x8] sm:$0xff] %vm22_vm1, %v192_v62 }

// kernel: ae_batch_norm_forward.11
= control target key start
LH: loop header
LB: loop body
LE: loop exit
PB: predicated region body
PF: predicated region fallthrough
CT: control target
= control target key end

     0   :  { %vm31_vm0 = vcmask 122880   ;;  %v328_v0 = vmov 0.0   ;;  %vm329_vm1 = vmmov 0   ;;  %vm211_vm2 = vcmask 1043456   ;;  %s433_s1 = inlined_call_operand.vmem [shape: bf16[128,16], index: 1, kind: input, shape index: {}]   ;;  %s434_s7 = inlined_call_operand.vmem [shape: f32[1,16], index: 7, kind: output, shape index: {}]   ;;  %s435_s0 = inlined_call_operand.vmem [shape: bf16[1,128], index: 0, kind: input, shape index: {}]   ;;  %s436_s3 = inlined_call_operand.vmem [shape: bf16[16,8], index: 3, kind: input, shape index: {}]   ;;  %s437_s2 = inlined_call_operand.vmem [shape: f32[1,16], index: 2, kind: input, shape index: {}]   ;;  %s438_s5 = inlined_call_operand.vmem [shape: bf16[8,16], index: 5, kind: input, shape index: {}]   ;;  %s439_s4 = inlined_call_operand.vmem [shape: f32[1,8], index: 4, kind: input, shape index: {}]   ;;  %s440_s6 = inlined_call_operand.vmem [shape: f32[1,16], index: 6, kind: input, shape index: {}]  }
   0x1   :  { %285 = vmatprep.subr.bf16.mxu0 %v328_v0  ;;  %v319_v1 = vld [vmem:[%s433_s1] sm:$0xff]   ;;  %301 = vmatprep.mubr.msk.bf16.mxu0 %vm329_vm1, %v328_v0  ;;  %32 = vst.msk [vmem:[%s434_s7] sm:$0x1] %vm31_vm0, %v328_v0  ;;  %v320_v2 = vld [vmem:[%s433_s1 + $0x8] sm:$0xff]   ;;  %v321_v3 = vld [vmem:[%s433_s1 + $0x10] sm:$0xff]   ;;  %vm159_vm3 = vcmask 130048  }
   0x2   :  { %305 = vmatprep.subr.bf16.mxu1 %v328_v0  ;;  %307 = vmatprep.mubr.msk.bf16.mxu1 %vm329_vm1, %v328_v0  ;;  %v322_v4 = vld [vmem:[%s433_s1 + $0x18] sm:$0xff]   ;;  %v323_v5 = vld [vmem:[%s433_s1 + $0x20] sm:$0xff]   ;;  %v324_v6 = vld [vmem:[%s433_s1 + $0x28] sm:$0xff]   ;;  %vm207_vm4 = vcmask 64512  }
   0x3   :  { %286 = vmatpush3.bf16.msra.mxu0 %v319_v1  ;;  %v325_v7 = vld [vmem:[%s433_s1 + $0x30] sm:$0xff]   ;;  %v326_v8 = vld [vmem:[%s433_s1 + $0x38] sm:$0xff]   ;;  %v34_v9 = vld [vmem:[%s435_s0] sm:$0x1] }
   0x4   :  { %287 = vmatprep.subr.bf16.mxu0 %v328_v0  ;;  %v327_v10 = vld [vmem:[%s436_s3] sm:$0xff]  }
   0x5   :  { %306 = vmatpush3.bf16.msra.mxu1 %v327_v10  ;;  %v146_v17 = vld [vmem:[%s437_s2] sm:$0x1] }
   0x6   :  { %311 = vmatprep.subr.bf16.mxu1 %v328_v0  ;;  %v205_v20 = vld [vmem:[%s438_s5] sm:$0xf] }
   0x7   :  { %288 = vmatpush3.bf16.msra.mxu0 %v320_v2  ;;  %v213_v23 = vsel %vm211_vm2, %v205_v20, 0  ;;  %v152_v24 = vld [vmem:[%s439_s4] sm:$0x1] }
   0x8   :  { %289 = vmatprep.subr.bf16.mxu0 %v328_v0  ;;  %v33_v11 = vld [vmem:[%s434_s7] sm:$0x1] }
   0x9   :  { %v206_v32 = vld [vmem:[%s440_s6] sm:$0x1] }
   0xb   :  { %290 = vmatpush3.bf16.msra.mxu0 %v321_v3 }
   0xc   :  { %291 = vmatprep.subr.bf16.mxu0 %v328_v0 }
   0xf   :  { %292 = vmatpush3.bf16.msra.mxu0 %v322_v4 }
  0x10   :  { %293 = vmatprep.subr.bf16.mxu0 %v328_v0 }
  0x13   :  { %294 = vmatpush3.bf16.msra.mxu0 %v323_v5 }
  0x14   :  { %295 = vmatprep.subr.bf16.mxu0 %v328_v0 }
  0x17   :  { %296 = vmatpush3.bf16.msra.mxu0 %v324_v6 }
  0x18   :  { %297 = vmatprep.subr.bf16.mxu0 %v328_v0 }
  0x1b   :  { %298 = vmatpush3.bf16.msra.mxu0 %v325_v7 }
  0x1c   :  { %299 = vmatprep.subr.bf16.mxu0 %v328_v0 }
  0x1f   :  { %300 = vmatpush3.bf16.msra.mxu0 %v326_v8 }
  0x22   :  { %302 = vmatmul.mubr.bf16.vlgmr.msra.gmra.mrb[0].mxu0 %v34_v9 }
  0xf5   :  { %v133_v12 = vpop.f32.mrb[0].mxu0 }
  0xf6   :  { %v139_v13 = vadd.f32 %v133_v12, %v33_v11  ;;  %v303_v14 = vpop.f32.mrb[1].mxu0 }
  0xf7   :  { %v136_v15 = vpop.f32.mrb[2].mxu0 }
  0xf8   :  { %141 = vst.msk [vmem:[%s434_s7] sm:$0x1] %vm31_vm0, %v139_v13  ;;  %v304_v16 = vpop.f32.mrb[3].mxu0 }
  0xff   :  { %v145_v18 = vld [vmem:[%s434_s7] sm:$0x1] }
 0x100   :  { %v147_v19 = vadd.f32 %v146_v17, %v145_v18 }
 0x102   :  { %v148_v21 = vmax.f32 %v147_v19, 0.0 }
 0x104   :  { %v149_v22 = vpack.c.bf16 %v148_v21, %v148_v21 }
 0x106   :  { %308 = vmatmul.mubr.msk.bf16.vlgmr.msra.gmra.mrb[0].mxu1 %vm159_vm3, %v149_v22 }
 0x107   :  { %312 = vmatpush3.bf16.msra.mxu1 %v213_v23  ;;  %313 = vmatprep.mubr.msk.bf16.mxu1 %vm329_vm1, %v328_v0 }
 0x1d9   :  { %v197_v25 = vpop.f32.mrb[0].mxu1 }
 0x1da   :  { %v198_v26 = vadd.f32 %v197_v25, %v152_v24  ;;  %v309_v27 = vpop.f32.mrb[1].mxu1 }
 0x1db   :  { %v200_v28 = vpop.f32.mrb[2].mxu1 }
 0x1dc   :  { %v203_v29 = vmax.f32 %v198_v26, 0.0  ;;  %v310_v30 = vpop.f32.mrb[3].mxu1 }
 0x1de   :  { %v204_v31 = vpack.c.bf16 %v203_v29, %v203_v29 }
 0x1e0   :  { %314 = vmatmul.mubr.msk.bf16.vlgmr.msra.gmra.mrb[4].mxu1 %vm207_vm4, %v204_v31 }
 0x2b3   :  { %v249_v33 = vpop.f32.mrb[4].mxu1 }
 0x2b4   :  { %v250_v34 = vadd.f32 %v249_v33, %v206_v32  ;;  %v315_v35 = vpop.f32.mrb[5].mxu1 }
 0x2b5   :  { %v252_v36 = vpop.f32.mrb[6].mxu1 }
 0x2b6   :  { %v255_v37 = vmax.f32 %v250_v34, 0.0  ;;  %v316_v38 = vpop.f32.mrb[7].mxu1 }
 0x2b8   :  { %256 = vst.msk [vmem:[%s434_s7] sm:$0x1] %vm31_vm0, %v255_v37 }

// kernel: ae_batch_norm_forward.12
= control target key start
LH: loop header
LB: loop body
LE: loop exit
PB: predicated region body
PF: predicated region fallthrough
CT: control target
= control target key end

     0   :  { %v88_v0 = vmov 0.0   ;;  %vm89_vm0 = vmmov 0   ;;  %vm25_vm1 = vcmask 130048   ;;  %s122_s1 = inlined_call_operand.vmem [shape: bf16[16,128], index: 1, kind: input, shape index: {}]   ;;  %s123_s0 = inlined_call_operand.vmem [shape: bf16[1,16], index: 0, kind: input, shape index: {}]   ;;  %s124_s2 = inlined_call_operand.vmem [shape: f32[1,128], index: 2, kind: input, shape index: {}]   ;;  %s125_s3 = inlined_call_operand.vmem [shape: f32[1,128], index: 3, kind: output, shape index: {}]  }
   0x1   :  { %79 = vmatprep.subr.bf16.mxu0 %v88_v0  ;;  %v87_v1 = vld [vmem:[%s122_s1] sm:$0xff]   ;;  %81 = vmatprep.mubr.msk.bf16.mxu0 %vm89_vm0, %v88_v0 }
   0x2   :  { %80 = vmatpush3.bf16.msra.mxu0 %v87_v1  ;;  %v15_v2 = vld [vmem:[%s123_s0] sm:$0x1] }
   0x3   :  { %v18_v3 = vld [vmem:[%s124_s2] sm:$0x1] }
   0x5   :  { %82 = vmatmul.mubr.msk.bf16.vlgmr.msra.gmra.mrb[0].mxu0 %vm25_vm1, %v15_v2 }
  0xd8   :  { %v63_v4 = vpop.f32.mrb[0].mxu0 }
  0xd9   :  { %v64_v5 = vadd.f32 %v63_v4, %v18_v3  ;;  %v83_v6 = vpop.f32.mrb[1].mxu0 }
  0xda   :  { %v66_v7 = vpop.f32.mrb[2].mxu0 }
  0xdb   :  { %v69_v8 = vmax.f32 %v64_v5, 0.0  ;;  %v84_v9 = vpop.f32.mrb[3].mxu0 }
  0xdd   :  { %70 = vst [vmem:[%s125_s3] sm:$0x1] %v69_v8 }

// kernel: ae_batch_norm_forward.13
= control target key start
LH: loop header
LB: loop body
LE: loop exit
PB: predicated region body
PF: predicated region fallthrough
CT: control target
= control target key end

     0   :  { %vm22_vm0 = vcmask 261120   ;;  %v221_v0 = vmov 0   ;;  %v222_v2 = vmov 0.0   ;;  %vm104_vm1 = vcmask 130048   ;;  %s304_s1 = inlined_call_operand.vmem [shape: bf16[144,32], index: 1, kind: input, shape index: {}]   ;;  %s305_s4 = inlined_call_operand.vmem [shape: f32[8,32], index: 4, kind: output, shape index: {}]   ;;  %s306_s0 = inlined_call_operand.vmem [shape: bf16[8,144], index: 0, kind: input, shape index: {}]   ;;  %s307_s2 = inlined_call_operand.vmem [shape: f32[8,1], index: 2, kind: input, shape index: {}]   ;;  %s308_s3 = inlined_call_operand.vmem [shape: f32[8,1], index: 3, kind: input, shape index: {}]  }
   0x1   :  { %108 = vmatprep.subr.bf16.mxu0 %v221_v0  ;;  %v208_v1 = vld [vmem:[%s304_s1] sm:$0xff]   ;;  %23 = vst.msk [vmem:[%s305_s4] sm:$0xff] %vm22_vm0, %v222_v2  ;;  %206 = vset.pattern.permute.xlu1 %v221_v0  ;;  %v209_v3 = vld [vmem:[%s304_s1 + $0x8] sm:$0xff]   ;;  %v210_v4 = vld [vmem:[%s304_s1 + $0x10] sm:$0xff]  }
   0x2   :  { %207 = vset.pattern.permute.xlu0 %v221_v0  ;;  %109 = vmatpush1.bf16.msra.mxu0 %v208_v1  ;;  %v25_v5 = vld [vmem:[%s306_s0] sm:$0xff]  ;;  %v211_v6 = vld [vmem:[%s304_s1 + $0x18] sm:$0xff]   ;;  %v213_v9 = vld [vmem:[%s304_s1 + $0x28] sm:$0xff]  }
   0x3   :  { %110 = vmatprep.subr.bf16.mxu0 %v221_v0  ;;  %v193_v7 = vcombine.high %v25_v5, %v25_v5  ;;  %v212_v8 = vld [vmem:[%s304_s1 + $0x20] sm:$0xff]   ;;  %v214_v10 = vld [vmem:[%s304_s1 + $0x30] sm:$0xff]   ;;  %v215_v11 = vld [vmem:[%s304_s1 + $0x38] sm:$0xff]   ;;  %v192_v13 = vcombine.low %v25_v5, %v25_v5 }
   0x4   :  { %v216_v12 = vld [vmem:[%s304_s1 + $0x40] sm:$0xff]  }
   0x5   :  { %203 = vmatprep.mubr.msk.bf16.mxu0 %vm104_vm1, %v193_v7  ;;  %v167_v32 = vld [vmem:[%s307_s2] sm:$0xff] }
   0x6   :  { %111 = vmatpush1.bf16.msra.mxu0 %v209_v3  ;;  %v171_v35 = vld [vmem:[%s308_s3] sm:$0xff] }
   0x7   :  { %112 = vmatprep.subr.bf16.mxu0 %v221_v0 }
   0x8   :  { %v24_v14 = vld [vmem:[%s305_s4] sm:$0xff] }
   0xa   :  { %113 = vmatpush1.bf16.msra.mxu0 %v210_v4 }
   0xb   :  { %114 = vmatprep.subr.bf16.mxu0 %v221_v0 }
   0xe   :  { %115 = vmatpush1.bf16.msra.mxu0 %v211_v6 }
   0xf   :  { %116 = vmatprep.subr.bf16.mxu0 %v221_v0 }
  0x12   :  { %117 = vmatpush1.bf16.msra.mxu0 %v212_v8 }
  0x13   :  { %118 = vmatprep.subr.bf16.mxu0 %v221_v0 }
  0x16   :  { %119 = vmatpush1.bf16.msra.mxu0 %v213_v9 }
  0x17   :  { %120 = vmatprep.subr.bf16.mxu0 %v221_v0 }
  0x1a   :  { %121 = vmatpush1.bf16.msra.mxu0 %v214_v10 }
  0x1b   :  { %122 = vmatprep.subr.bf16.mxu0 %v221_v0 }
  0x1e   :  { %123 = vmatpush1.bf16.msra.mxu0 %v215_v11 }
  0x1f   :  { %124 = vmatprep.subr.bf16.mxu0 %v221_v0 }
  0x22   :  { %125 = vmatpush1.bf16.msra.mxu0 %v216_v12 }
  0x25   :  { %141 = vmatmul.mubr.bf16.vlgmr.msra.gmra.mrb[0].mxu0 %v192_v13 }
  0xf8   :  { %v142_v15 = vpop.f32.mrb[0].mxu0 }
  0xf9   :  { %v148_v16 = vadd.f32 %v142_v15, %v24_v14  ;;  %v144_v17 = vpop.f32.mrb[1].mxu0 }
  0xfa   :  { %v145_v18 = vpop.f32.mrb[2].mxu0 }
  0xfb   :  { %150 = vst.msk [vmem:[%s305_s4] sm:$0xff] %vm22_vm0, %v148_v16  ;;  %v146_v19 = vpop.f32.mrb[3].mxu0 }
 0x102   :  { %v154_v20 = vld [vmem:[%s305_s4] sm:$0xff] }
 0x103   :  { %v155_v21 = vsel %vm22_vm0, %v154_v20, 0.0  ;;  %v158_v22 = vmul.f32 %v154_v20, %v154_v20 }
 0x104   :  { %156 = vadd.xlane.f32.xlu0 %v155_v21 }
 0x105   :  { %v159_v23 = vsel %vm22_vm0, %v158_v22, 0.0 }
 0x108   :  { %160 = vadd.xlane.f32.xlu0 %v159_v23 }
 0x191   :  { %v157_v24 = vpop.xlane.xlu0 %156 }
 0x192   :  { %v162_v25 = vmul.f32 0.03125, %v157_v24 }
 0x194   :  { %v164_v27 = vmul.f32 %v162_v25, %v162_v25 }
 0x195   :  { %v161_v26 = vpop.xlane.xlu0 %160 }
 0x196   :  { %v163_v28 = vmul.f32 0.03125, %v161_v26 }
 0x198   :  { %v165_v29 = vsub.f32 %v163_v28, %v164_v27 }
 0x19a   :  { %v166_v30 = vmax.f32 %v165_v29, 0.0 }
 0x19c   :  { %v168_v31 = vadd.f32 1e-05, %v166_v30 }
 0x19e   :  { %219 = vrsqrt.f32 %v168_v31 }
 0x1a8   :  { %v220_v33 = vpop.eup %219 }
 0x1a9   :  { %v170_v34 = vmul.f32 %v220_v33, %v167_v32 }
 0x1ab   :  { %176 = vperm.xlu1 %206, %v170_v34   ;;  %v172_v36 = vmul.f32 %v170_v34, %v162_v25 }
 0x1ad   :  { %v173_v37 = vsub.f32 %v171_v35, %v172_v36 }
 0x1af   :  { %182 = vperm.xlu1 %206, %v173_v37  }
 0x22a   :  { %v177_v38 = vpop.permute.xlu1 %176 }
 0x22b   :  { %v179_v39 = vmul.f32 %v177_v38, %v154_v20 }
 0x22e   :  { %v183_v40 = vpop.permute.xlu1 %182 }
 0x22f   :  { %v185_v41 = vadd.f32 %v183_v40, %v179_v39 }
 0x231   :  { %v186_v42 = vmax.f32 %v185_v41, 0.0 }
 0x233   :  { %187 = vst.msk [vmem:[%s305_s4] sm:$0xff] %vm22_vm0, %v186_v42 }

// kernel: ae_batch_norm_forward.14
= control target key start
LH: loop header
LB: loop body
LE: loop exit
PB: predicated region body
PF: predicated region fallthrough
CT: control target
= control target key end

     0   :  { %v260_v0 = vmov 0   ;;  %v261_v2 = vmov 0.0   ;;  %vm135_vm0 = vcmask 588800   ;;  %vm139_vm1 = vcmask 1043456   ;;  %s353_s1 = inlined_call_operand.vmem [shape: bf16[200,128], index: 1, kind: input, shape index: {}]   ;;  %s354_s4 = inlined_call_operand.vmem [shape: f32[4,128], index: 4, kind: output, shape index: {}]   ;;  %s355_s0 = inlined_call_operand.vmem [shape: bf16[4,200], index: 0, kind: input, shape index: {}]   ;;  %s356_s2 = inlined_call_operand.vmem [shape: f32[4,1], index: 2, kind: input, shape index: {}]   ;;  %s357_s3 = inlined_call_operand.vmem [shape: f32[4,1], index: 3, kind: input, shape index: {}]  }
   0x1   :  { %143 = vmatprep.subr.bf16.mxu0 %v260_v0  ;;  %v245_v1 = vld [vmem:[%s353_s1] sm:$0xff]   ;;  %22 = vst [vmem:[%s354_s4] sm:$0xf] %v261_v2  ;;  %243 = vset.pattern.permute.xlu1 %v260_v0  ;;  %v246_v3 = vld [vmem:[%s353_s1 + $0x8] sm:$0xff]   ;;  %v247_v4 = vld [vmem:[%s353_s1 + $0x10] sm:$0xff]  }
   0x2   :  { %244 = vset.pattern.permute.xlu0 %v260_v0  ;;  %144 = vmatpush1.bf16.msra.mxu0 %v245_v1  ;;  %v248_v5 = vld [vmem:[%s353_s1 + $0x18] sm:$0xff]   ;;  %v226_v6 = vld.sshfl [vmem:[%s355_s0] sm:$0x33 pattern:$0x76325410]  ;;  %v250_v9 = vld [vmem:[%s353_s1 + $0x28] sm:$0xff]  }
   0x3   :  { %145 = vmatprep.subr.bf16.mxu0 %v260_v0  ;;  %v249_v7 = vld [vmem:[%s353_s1 + $0x20] sm:$0xff]   ;;  %v58_v8 = vcombine.high %v226_v6, %v226_v6  ;;  %v251_v10 = vld [vmem:[%s353_s1 + $0x30] sm:$0xff]   ;;  %v252_v11 = vld [vmem:[%s353_s1 + $0x38] sm:$0xff]  }
   0x4   :  { %v253_v12 = vld [vmem:[%s353_s1 + $0x40] sm:$0xff]   ;;  %v254_v13 = vld [vmem:[%s353_s1 + $0x48] sm:$0xff]   ;;  %v255_v14 = vld [vmem:[%s353_s1 + $0x50] sm:$0xff]  }
   0x5   :  { %240 = vmatprep.mubr.msk.bf16.mxu0 %vm135_vm0, %v58_v8  ;;  %v256_v15 = vld [vmem:[%s353_s1 + $0x58] sm:$0xff]   ;;  %v257_v16 = vld [vmem:[%s353_s1 + $0x60] ss:$0 sps:$4 sm:$0xff]  }
   0x6   :  { %146 = vmatpush1.bf16.msra.mxu0 %v246_v3  ;;  %v141_v17 = vsel %vm139_vm1, %v257_v16, 0  ;;  %v201_v36 = vld [vmem:[%s356_s2] sm:$0xf] }
   0x7   :  { %147 = vmatprep.subr.bf16.mxu0 %v260_v0  ;;  %v205_v39 = vld [vmem:[%s357_s3] sm:$0xf] }
   0x8   :  { %v23_v18 = vld [vmem:[%s354_s4] sm:$0xf] }
   0xa   :  { %148 = vmatpush1.bf16.msra.mxu0 %v247_v4 }
   0xb   :  { %149 = vmatprep.subr.bf16.mxu0 %v260_v0 }
   0xe   :  { %150 = vmatpush1.bf16.msra.mxu0 %v248_v5 }
   0xf   :  { %151 = vmatprep.subr.bf16.mxu0 %v260_v0 }
  0x12   :  { %152 = vmatpush1.bf16.msra.mxu0 %v249_v7 }
  0x13   :  { %153 = vmatprep.subr.bf16.mxu0 %v260_v0 }
  0x16   :  { %154 = vmatpush1.bf16.msra.mxu0 %v250_v9 }
  0x17   :  { %155 = vmatprep.subr.bf16.mxu0 %v260_v0 }
  0x1a   :  { %156 = vmatpush1.bf16.msra.mxu0 %v251_v10 }
  0x1b   :  { %157 = vmatprep.subr.bf16.mxu0 %v260_v0 }
  0x1e   :  { %158 = vmatpush1.bf16.msra.mxu0 %v252_v11 }
  0x1f   :  { %159 = vmatprep.subr.bf16.mxu0 %v260_v0 }
  0x22   :  { %160 = vmatpush1.bf16.msra.mxu0 %v253_v12 }
  0x23   :  { %161 = vmatprep.subr.bf16.mxu0 %v260_v0 }
  0x26   :  { %162 = vmatpush1.bf16.msra.mxu0 %v254_v13 }
  0x27   :  { %163 = vmatprep.subr.bf16.mxu0 %v260_v0 }
  0x2a   :  { %164 = vmatpush1.bf16.msra.mxu0 %v255_v14 }
  0x2b   :  { %165 = vmatprep.subr.bf16.mxu0 %v260_v0 }
  0x2e   :  { %166 = vmatpush1.bf16.msra.mxu0 %v256_v15 }
  0x2f   :  { %167 = vmatprep.subr.bf16.mxu0 %v260_v0 }
  0x32   :  { %168 = vmatpush1.bf16.msra.mxu0 %v141_v17 }
  0x35   :  { %176 = vmatmul.mubr.bf16.vlgmr.msra.gmra.mrb[0].mxu0 %v226_v6 }
 0x108   :  { %v177_v19 = vpop.f32.mrb[0].mxu0 }
 0x109   :  { %v183_v20 = vadd.f32 %v177_v19, %v23_v18  ;;  %v179_v21 = vpop.f32.mrb[1].mxu0 }
 0x10a   :  { %v180_v22 = vpop.f32.mrb[2].mxu0 }
 0x10b   :  { %184 = vst [vmem:[%s354_s4] sm:$0xf] %v183_v20  ;;  %v181_v23 = vpop.f32.mrb[3].mxu0 }
 0x112   :  { %v188_v24 = vld [vmem:[%s354_s4] sm:$0xf] }
 0x113   :  { %v189_v25 = vsel %vm139_vm1, %v188_v24, 0.0  ;;  %v192_v26 = vmul.f32 %v188_v24, %v188_v24 }
 0x114   :  { %190 = vadd.xlane.f32.xlu0 %v189_v25 }
 0x115   :  { %v193_v27 = vsel %vm139_vm1, %v192_v26, 0.0 }
 0x118   :  { %194 = vadd.xlane.f32.xlu0 %v193_v27 }
 0x1a1   :  { %v191_v28 = vpop.xlane.xlu0 %190 }
 0x1a2   :  { %v196_v29 = vmul.f32 0.0078125, %v191_v28 }
 0x1a4   :  { %v198_v31 = vmul.f32 %v196_v29, %v196_v29 }
 0x1a5   :  { %v195_v30 = vpop.xlane.xlu0 %194 }
 0x1a6   :  { %v197_v32 = vmul.f32 0.0078125, %v195_v30 }
 0x1a8   :  { %v199_v33 = vsub.f32 %v197_v32, %v198_v31 }
 0x1aa   :  { %v200_v34 = vmax.f32 %v199_v33, 0.0 }
 0x1ac   :  { %v202_v35 = vadd.f32 1e-05, %v200_v34 }
 0x1ae   :  { %258 = vrsqrt.f32 %v202_v35 }
 0x1b8   :  { %v259_v37 = vpop.eup %258 }
 0x1b9   :  { %v204_v38 = vmul.f32 %v259_v37, %v201_v36 }
 0x1bb   :  { %210 = vperm.xlu1 %243, %v204_v38   ;;  %v206_v40 = vmul.f32 %v204_v38, %v196_v29 }
 0x1bd   :  { %v207_v41 = vsub.f32 %v205_v39, %v206_v40 }
 0x1bf   :  { %216 = vperm.xlu1 %243, %v207_v41  }
 0x23a   :  { %v211_v42 = vpop.permute.xlu1 %210 }
 0x23b   :  { %v213_v43 = vmul.f32 %v211_v42, %v188_v24 }
 0x23e   :  { %v217_v44 = vpop.permute.xlu1 %216 }
 0x23f   :  { %v219_v45 = vadd.f32 %v217_v44, %v213_v43 }
 0x241   :  { %v220_v46 = vmax.f32 %v219_v45, 0.0 }
 0x243   :  { %221 = vst [vmem:[%s354_s4] sm:$0xf] %v220_v46 }

// kernel: ae_batch_norm_forward.15
= control target key start
LH: loop header
LB: loop body
LE: loop exit
PB: predicated region body
PF: predicated region fallthrough
CT: control target
= control target key end

     0   :  { %v325_v1 = vmov 0   ;;  %vm91_vm0 = vcmask 1041408   ;;  %vm87_vm1 = vcmask 293888   ;;  %v326_v18 = vmov 0.0   ;;  %s434_s1 = inlined_call_operand.vmem [shape: bf16[36,512], index: 1, kind: input, shape index: {}]   ;;  %s435_s0 = inlined_call_operand.vmem [shape: bf16[3,36], index: 0, kind: input, shape index: {}]   ;;  %s436_s4 = inlined_call_operand.vmem [shape: f32[3,512], index: 4, kind: output, shape index: {}]   ;;  %s437_s2 = inlined_call_operand.vmem [shape: f32[3,1], index: 2, kind: input, shape index: {}]   ;;  %s438_s3 = inlined_call_operand.vmem [shape: f32[3,1], index: 3, kind: input, shape index: {}]  }
   0x1   :  { %v305_v0 = vld [vmem:[%s434_s1 + $0x4] ss:$16 sps:$4 sm:$0xff]   ;;  %136 = vmatprep.mubr.bf16.mxu0 %v325_v1  ;;  %177 = vmatprep.mubr.bf16.mxu1 %v325_v1  ;;  %v307_v2 = vld [vmem:[%s434_s1] ss:$16 sps:$4 sm:$0xff]   ;;  %v308_v3 = vld [vmem:[%s434_s1 + $0xc] ss:$16 sps:$4 sm:$0xff]  }
   0x2   :  { %303 = vset.pattern.permute.xlu1 %v325_v1  ;;  %304 = vset.pattern.permute.xlu0 %v325_v1  ;;  %v310_v4 = vld [vmem:[%s434_s1 + $0x8] ss:$16 sps:$4 sm:$0xff]   ;;  %v311_v5 = vld [vmem:[%s434_s1 + $0x24] ss:$16 sps:$4 sm:$0xff]   ;;  %v313_v6 = vld [vmem:[%s434_s1 + $0x20] ss:$16 sps:$4 sm:$0xff]  }
   0x3   :  { %104 = vmatprep.subr.bf16.mxu0 %v305_v0  ;;  %145 = vmatprep.subr.bf16.mxu1 %v308_v3  ;;  %v314_v7 = vld [vmem:[%s434_s1 + $0x2c] ss:$16 sps:$4 sm:$0xff]   ;;  %v316_v8 = vld [vmem:[%s434_s1 + $0x28] ss:$16 sps:$4 sm:$0xff]   ;;  %v35_v9 = vld [vmem:[%s434_s1 + $0x40] sm:$0x33] }
   0x4   :  { %105 = vmatpush1.bf16.msra.mxu0 %v307_v2  ;;  %146 = vmatpush1.bf16.msra.mxu1 %v310_v4  ;;  %v36_v10 = vld [vmem:[%s434_s1 + $0x48] sm:$0x33]  ;;  %v293_v11 = vcombine.high %v35_v9, %v35_v9  ;;  %v292_v12 = vcombine.low %v35_v9, %v35_v9  ;;  %v26_v17 = vld [vmem:[%s435_s0] sm:$0x3]  ;;  %22 = vst [vmem:[%s436_s4] sm:$0x77] %v326_v18  ;;  %vm209_vm2 = vcmask 1042432  }
   0x5   :  { %106 = vmatprep.subr.bf16.mxu0 %v311_v5  ;;  %147 = vmatprep.subr.bf16.mxu1 %v314_v7  ;;  %v295_v13 = vcombine.high %v36_v10, %v36_v10  ;;  %v294_v14 = vcombine.low %v36_v10, %v36_v10  ;;  %23 = vst [vmem:[%s436_s4 + $0x8] sm:$0x77] %v326_v18  ;;  %v241_v63 = vld [vmem:[%s437_s2] sm:$0x7]  ;;  %v327_v5 = vmov 839922192   ;;  %v255_v7 = vlaneseq }
   0x6   :  { %v93_v15 = vsel %vm91_vm0, %v292_v12, 0  ;;  %v245_v2 = vld [vmem:[%s438_s3] sm:$0x7] }
   0x7   :  { %v99_v16 = vsel %vm91_vm0, %v294_v14, 0  ;;  %v256_v9 = vshrl.u32 %v255_v7, 7 }
   0x8   :  { %107 = vmatpush1.bf16.msra.mxu0 %v313_v6  ;;  %148 = vmatpush1.bf16.msra.mxu1 %v316_v8  ;;  %v253_v6 = vunpack.c.l.s4 %v327_v5 }
   0x9   :  { %296 = vmatprep.subr.msk.bf16.mxu0 %vm91_vm0, %v293_v11  ;;  %298 = vmatprep.subr.msk.bf16.mxu1 %vm91_vm0, %v295_v13 }
   0xa   :  { %v254_v8 = vunpack.c.0.s8 %v253_v6 }
   0xb   :  { %v24_v20 = vld [vmem:[%s436_s4] sm:$0x77] }
   0xc   :  { %109 = vmatpush1.bf16.msra.mxu0 %v93_v15  ;;  %150 = vmatpush1.bf16.msra.mxu1 %v99_v16  ;;  %v25_v25 = vld [vmem:[%s436_s4 + $0x8] sm:$0x77]  ;;  %v257_v10 = vsub.s32 %v254_v8, %v256_v9 }
   0xf   :  { %297 = vmatmul.mubr.msk.bf16.vlgmr.msra.gmra.mrb[0].mxu0 %vm87_vm1, %v26_v17  ;;  %299 = vmatmul.mubr.msk.bf16.vlgmr.msra.gmra.mrb[0].mxu1 %vm87_vm1, %v26_v17 }
  0xe2   :  { %v138_v19 = vpop.f32.mrb[0].mxu0  ;;  %v179_v23 = vpop.f32.mrb[0].mxu1 }
  0xe3   :  { %v140_v21 = vpop.f32.mrb[1].mxu0  ;;  %v181_v26 = vpop.f32.mrb[1].mxu1 }
  0xe4   :  { %v190_v22 = vcombine.low %v138_v19, %v140_v21  ;;  %v142_v24 = vpop.f32.mrb[2].mxu0  ;;  %v191_v29 = vcombine.low %v179_v23, %v181_v26  ;;  %v183_v30 = vpop.f32.mrb[2].mxu1 }
  0xe5   :  { %v143_v27 = vpop.f32.mrb[3].mxu0  ;;  %v184_v31 = vpop.f32.mrb[3].mxu1 }
  0xe6   :  { %v194_v28 = vadd.f32 %v190_v22, %v24_v20  ;;  %v195_v32 = vadd.f32 %v191_v29, %v25_v25 }
  0xe8   :  { %196 = vst [vmem:[%s436_s4] sm:$0x77] %v194_v28  ;;  %197 = vst [vmem:[%s436_s4 + $0x8] sm:$0x77] %v195_v32 }
  0xef   :  { %v201_v33 = vld [vmem:[%s436_s4] sm:$0x77]  ;;  %v202_v36 = vld [vmem:[%s436_s4 + $0x8] sm:$0x77] }
  0xf0   :  { %v205_v34 = vcombine.high %v201_v33, %v201_v33  ;;  %v219_v35 = vmul.f32 %v201_v33, %v201_v33  ;;  %v210_v37 = vsel %vm209_vm2, %v201_v33, 0.0  ;;  %v206_v38 = vcombine.high %v202_v36, %v202_v36 }
  0xf1   :  { %v213_v40 = vsel %vm209_vm2, %v202_v36, 0.0  ;;  %v220_v41 = vmul.f32 %v202_v36, %v202_v36 }
  0xf2   :  { %v211_v39 = vsel %vm209_vm2, %v205_v34, 0.0  ;;  %v223_v43 = vcombine.high %v219_v35, %v219_v35  ;;  %v215_v44 = vsel %vm209_vm2, %v206_v38, 0.0  ;;  %v227_v47 = vsel %vm209_vm2, %v219_v35, 0.0 }
  0xf3   :  { %v212_v42 = vadd.f32 %v211_v39, %v210_v37  ;;  %v224_v45 = vcombine.high %v220_v41, %v220_v41  ;;  %v230_v49 = vsel %vm209_vm2, %v220_v41, 0.0 }
  0xf4   :  { %v228_v48 = vsel %vm209_vm2, %v223_v43, 0.0 }
  0xf5   :  { %v214_v46 = vadd.f32 %v213_v40, %v212_v42  ;;  %v229_v50 = vadd.f32 %v228_v48, %v227_v47  ;;  %v232_v53 = vsel %vm209_vm2, %v224_v45, 0.0 }
  0xf7   :  { %v216_v51 = vadd.f32 %v215_v44, %v214_v46  ;;  %v231_v52 = vadd.f32 %v230_v49, %v229_v50 }
  0xf9   :  { %217 = vadd.xlane.f32.xlu0 %v216_v51  ;;  %v233_v54 = vadd.f32 %v232_v53, %v231_v52 }
  0xfd   :  { %234 = vadd.xlane.f32.xlu0 %v233_v54 }
 0x186   :  { %v218_v55 = vpop.xlane.xlu0 %217 }
 0x187   :  { %v236_v56 = vmul.f32 0.001953125, %v218_v55 }
 0x189   :  { %v238_v58 = vmul.f32 %v236_v56, %v236_v56 }
 0x18a   :  { %v235_v57 = vpop.xlane.xlu0 %234 }
 0x18b   :  { %v237_v59 = vmul.f32 0.001953125, %v235_v57 }
 0x18d   :  { %v239_v60 = vsub.f32 %v237_v59, %v238_v58 }
 0x18f   :  { %v240_v61 = vmax.f32 %v239_v60, 0.0 }
 0x191   :  { %v242_v62 = vadd.f32 1e-05, %v240_v61 }
 0x193   :  { %323 = vrsqrt.f32 %v242_v62 }
 0x19d   :  { %v324_v0 = vpop.eup %323 }
 0x19e   :  { %v244_v1 = vmul.f32 %v324_v0, %v241_v63 }
 0x1a0   :  { %250 = vperm.xlu1 %303, %v244_v1   ;;  %v246_v3 = vmul.f32 %v244_v1, %v236_v56 }
 0x1a2   :  { %v247_v4 = vsub.f32 %v245_v2, %v246_v3 }
 0x1a4   :  { %264 = vperm.xlu1 %303, %v247_v4  }
 0x21f   :  { %v251_v11 = vpop.permute.xlu1 %250 }
 0x220   :  { %v258_v12 = vrot.slane %v251_v11, %v257_v10 }
 0x222   :  { %v260_v14 = vmul.f32 %v258_v12, %v201_v33  ;;  %v261_v15 = vmul.f32 %v258_v12, %v202_v36 }
 0x223   :  { %v265_v13 = vpop.permute.xlu1 %264 }
 0x224   :  { %v272_v16 = vrot.slane %v265_v13, %v257_v10 }
 0x226   :  { %v274_v17 = vadd.f32 %v272_v16, %v260_v14  ;;  %v275_v18 = vadd.f32 %v272_v16, %v261_v15 }
 0x228   :  { %v276_v19 = vmax.f32 %v274_v17, 0.0  ;;  %v277_v20 = vmax.f32 %v275_v18, 0.0 }
 0x22a   :  { %278 = vst [vmem:[%s436_s4] sm:$0x77] %v276_v19  ;;  %279 = vst [vmem:[%s436_s4 + $0x8] sm:$0x77] %v277_v20 }

</bundles_post_ra>
